<compile_context>
chip_gen: v5e
topology: v5e:2x2
jax: 0.10.0
libtpu: 0.0.40
codegen_flags: <defaults>
</compile_context>

<pallas_src>
import functools

import jax
import jax.numpy as jnp
import numpy as np
from jax.experimental import pallas as pl
from jax.experimental.pallas import tpu as pltpu

F32_TINY = float(jnp.finfo(jnp.float32).tiny)   # torch.finfo().tiny for float32

LANE = 128                     # TPU lane width (last dim of every vreg)
SUBLANE = 8                    # f32 sublane count
MAX_TILE_ROWS = 1024           # 1024 * 128 * 4 B = 512 KiB per f32 block
MIN_GRID = 2                   # keep >= 2 tiles so v7x's two TCs both get work
SAMPLE_VMEM_BUDGET = 26 << 20  # double-buffered live-set budget for sampling
SAMPLE_VMEM_LIMIT = 32 << 20   # explicit scoped-VMEM request (safe on v5e/v6e/v7x)
MAX_SAMPLES_PER_CALL = 8       # bounds unrolled code size in the sample kernel


def _round_up(x: int, m: int) -> int:
    return -(-x // m) * m


def _stat_layout(num_params: int):
    """Sublane-dense layout for the flattened parameter vector: (rows_pad, 128).

    Picks the largest tile <= MAX_TILE_ROWS while keeping at least MIN_GRID grid
    steps (when the model is big enough), so both v7x TensorCores get work.
    """
    rows = -(-num_params // LANE)
    tile_rows = min(MAX_TILE_ROWS, _round_up(max(-(-rows // MIN_GRID), 1), SUBLANE))
    rows_pad = _round_up(rows, tile_rows)
    return rows_pad, tile_rows


def _sample_k_max(tile_rows: int, rank: int) -> int:
    """Max posterior samples per kernel pass within the VMEM budget.

    Double-buffered live blocks per grid step: mean + sq + rank devs + K z1 + K out.
    """
    tile_bytes = tile_rows * LANE * 4
    budget_blocks = SAMPLE_VMEM_BUDGET // (2 * tile_bytes)
    return int(max(1, min(MAX_SAMPLES_PER_CALL, (budget_blocks - 2 - rank) // 2)))


# ----------------------------------------------------------------------------
# Pallas kernels
# ----------------------------------------------------------------------------
def _collect_kernel(ab_ref, w_ref, mean_ref, sq_ref,
                    new_mean_ref, new_sq_ref, dev_ref):
    """SWAG.collect_model moment update over one (tile_rows, 128) tile.

    ab_ref: SMEM (2,) f32 = [n/(n+1), 1/(n+1)] precomputed on the host.
    mean/sq are aliased input->output (in-place); dev is the new deviation row,
    computed w.r.t. the *updated* mean (standard SWAG), written to a fresh buffer.
    """
    a = ab_ref[0]
    b = ab_ref[1]
    w = w_ref[...]
    new_mean = mean_ref[...] * a + w * b
    new_mean_ref[...] = new_mean
    new_sq_ref[...] = sq_ref[...] * a + (w * w) * b
    dev_ref[...] = w - new_mean


def _sample_kernel(*refs, var_mult, rank):
    """SWAG modelwise sample, K draws per tile:
         out[k] = mean + sqrt(var * var_mult) * z1[k] + sum_r z2[k,r] * dev[r]
    z2 lives in SMEM, already scaled by 1/sqrt(2*(rank-1)); the low-rank term is
    an unrolled VPU FMA (even/odd partial sums) riding in spare VALU slots of an
    HBM-bound loop.  mean/sq/dev are streamed once per K samples.
    """
    if rank > 1:
        z2_ref, mean_ref, sq_ref, z1_ref = refs[:4]
        dev_refs = refs[4:4 + rank]
        out_ref = refs[4 + rank]
    else:
        mean_ref, sq_ref, z1_ref, out_ref = refs
        z2_ref = None
        dev_refs = ()

    num_samples = z1_ref.shape[0]
    mean = mean_ref[...]
    var = jnp.maximum(sq_ref[...] - mean * mean, F32_TINY)   # torch.clamp(..., tiny)
    sig = jnp.sqrt(var * var_mult)
    devs = [d[...] for d in dev_refs]                        # hoisted VMEM reads

    for k in range(num_samples):                             # unrolled over K draws
        acc = mean + sig * z1_ref[k]
        if rank > 1:
            even = None
            odd = None
            for r in range(rank):                            # unrolled: rank FMAs
                term = z2_ref[k, r] * devs[r]
                if r % 2 == 0:
                    even = term if even is None else even + term
                else:
                    odd = term if odd is None else odd + term
            acc = acc + even
            if odd is not None:
                acc = acc + odd
        out_ref[k] = acc


def _mlp_forward_kernel(x_ref, w1t_ref, w2t_ref, out_ref):
    """Base model forward: relu(x @ W1^T) @ W2^T, weights pre-transposed to (in, out)."""
    h = jnp.maximum(jnp.dot(x_ref[...], w1t_ref[...],
                            preferred_element_type=jnp.float32), 0.0)
    out_ref[...] = jnp.dot(h, w2t_ref[...], preferred_element_type=jnp.float32)


# ----------------------------------------------------------------------------
# pallas_call wrappers
# ----------------------------------------------------------------------------
def _collect_pallas(ab, w, mean, sq, *, tile_rows):
    rows_pad = mean.shape[0]
    grid = (rows_pad // tile_rows,)
    stat = pl.BlockSpec((tile_rows, LANE), lambda i: (i, 0))
    return pl.pallas_call(
        _collect_kernel,
        grid=grid,
        out_shape=(jax.ShapeDtypeStruct((rows_pad, LANE), jnp.float32),) * 3,
        in_specs=[pl.BlockSpec(memory_space=pltpu.MemorySpace.SMEM),   # ab scalars
                  stat, stat, stat],                                   # w, mean, sq
        out_specs=(stat, stat, stat),           # new_mean, new_sq, dev_row
        input_output_aliases={2: 0, 3: 1},      # mean/sq updated in place
        compiler_params=pltpu.CompilerParams(
            dimension_semantics=("parallel",)),  # v7x: 2 TCs split the P tiles
    )(ab, w, mean, sq)


@functools.partial(jax.jit, static_argnames=("tile_rows",), donate_argnums=(2, 3))
def _collect_step(ab, w, mean, sq, *, tile_rows):
    """One SWAG collect step: in-place moment update + fresh deviation row (6P words)."""
    return _collect_pallas(ab, w, mean, sq, tile_rows=tile_rows)


@functools.partial(jax.jit, static_argnames=("var_mult", "tile_rows"))
def _sample_call(z2s, mean, sq, z1, devs, *, var_mult, tile_rows):
    rows_pad = mean.shape[0]
    rank = len(devs)
    num_samples = z1.shape[0]
    grid = (rows_pad // tile_rows,)
    stat = pl.BlockSpec((tile_rows, LANE), lambda i: (i, 0))
    kspec = pl.BlockSpec((num_samples, tile_rows, LANE), lambda i: (0, i, 0))
    kernel = functools.partial(_sample_kernel, var_mult=var_mult, rank=rank)
    if rank > 1:
        in_specs = ([pl.BlockSpec(memory_space=pltpu.MemorySpace.SMEM),   # z2 (scaled)
                     stat, stat, kspec]                                   # mean, sq, z1
                    + [stat] * rank)                                      # retained devs only
        args = (z2s, mean, sq, z1) + tuple(devs)
    else:
        in_specs = [stat, stat, kspec]
        args = (mean, sq, z1)
    return pl.pallas_call(
        kernel,
        grid=grid,
        out_shape=jax.ShapeDtypeStruct((num_samples, rows_pad, LANE), jnp.float32),
        in_specs=in_specs,
        out_specs=kspec,
        compiler_params=pltpu.CompilerParams(
            dimension_semantics=("parallel",),
            vmem_limit_bytes=SAMPLE_VMEM_LIMIT),
    )(*args)


def prepare_mlp_weights(w1, w2):
    """One-time (per sampled / averaged model) transpose to MXU-native (in, out) layout."""
    return jnp.asarray(w1, jnp.float32).T, jnp.asarray(w2, jnp.float32).T


@jax.jit
def mlp_forward(x, w1t, w2t):
    """x: (B, in); w1t: (in, hid); w2t: (hid, out)  (already transposed once per model)."""
    B = x.shape[0]
    out_f = w2t.shape[1]
    full = lambda shape: pl.BlockSpec(shape, lambda i: (0,) * len(shape))
    # TODO(synk): production path: bf16 inputs with f32 accumulation, batch padded/tiled
    # toward the MXU-native M (128 on v5e, 256 on v6e/v7x) on a ("parallel", ...) grid.
    return pl.pallas_call(
        _mlp_forward_kernel,
        grid=(1,),
        out_shape=jax.ShapeDtypeStruct((B, out_f), jnp.float32),
        in_specs=[full(x.shape), full(w1t.shape), full(w2t.shape)],
        out_specs=full((B, out_f)),
    )(x, w1t, w2t)


# ----------------------------------------------------------------------------
# SWAG glue (buffer bookkeeping mirrors the PyTorch module; compute is in Pallas)
# ----------------------------------------------------------------------------
class SWAGPallas:
    def __init__(self, param_shapes, max_rank=20):
        assert max_rank >= 0
        self.param_shapes = [tuple(int(d) for d in s) for s in param_shapes]
        self.num_parameters = int(sum(int(np.prod(s)) for s in self.param_shapes))
        self.max_rank = max_rank
        self.rows_pad, self.tile_rows = _stat_layout(self.num_parameters)
        shape2d = (self.rows_pad, LANE)
        self.mean = jnp.zeros(shape2d, jnp.float32)
        self.sq_mean = jnp.zeros(shape2d, jnp.float32)
        self.n_models = 0
        # Deviation ring as a Python list of (rows_pad, 128) arrays, oldest first
        # (identical ordering to torch's drop-oldest / cat): collect writes each
        # new row into a fresh buffer, so there is no O(P) ring copy per step.
        self.deviations = []

    @property
    def rank(self):
        return len(self.deviations)

    # -- flatten / unflatten between per-layer params and the (rows, 128) layout --
    def flatten_params(self, params):
        flat = jnp.concatenate([jnp.asarray(p, jnp.float32).reshape(-1) for p in params])
        pad = self.rows_pad * LANE - flat.shape[0]
        if pad:
            flat = jnp.pad(flat, (0, pad))
        return flat.reshape(self.rows_pad, LANE)

    def unflatten_params(self, mat):
        vec = mat.reshape(-1)[: self.num_parameters]
        out, off = [], 0
        for s in self.param_shapes:
            n = int(np.prod(s))
            out.append(vec[off:off + n].reshape(s))
            off += n
        return tuple(out)

    # -- SWAG.collect_model --
    def collect_model(self, params):
        w = self.flatten_params(params)
        n = float(self.n_models)
        ab = jnp.array([n / (n + 1.0), 1.0 / (n + 1.0)], jnp.float32)
        self.mean, self.sq_mean, dev = _collect_step(
            ab, w, self.mean, self.sq_mean, tile_rows=self.tile_rows)
        self.n_models += 1
        if self.deviations and len(self.deviations) + 1 > self.max_rank:
            self.deviations.pop(0)          # drop oldest, exactly like torch
        self.deviations.append(dev)

    # -- SWAG.averaged_model (parameters only) --
    def averaged_params(self):
        return self.unflatten_params(self.mean)

    # -- SWAG._sampled_model_modelwise (parameters only), batched over K draws --
    def _draw_sample_chunk(self, key, num_samples):
        rank = self.rank
        k1, k2 = jax.random.split(key)
        z1 = jax.random.normal(k1, (num_samples, self.rows_pad, LANE), jnp.float32)
        if rank > 1:
            var_mult = 0.5
            z2 = jax.random.normal(k2, (num_samples, rank), jnp.float32)
            z2s = z2 * jnp.float32(1.0 / (2.0 * (rank - 1)) ** 0.5)
            devs = tuple(self.deviations)
        else:
            var_mult = 1.0   # torch: rank <= 1 -> mean + sqrt(var)*z1, no low-rank term
            z2 = jnp.zeros((num_samples, 1), jnp.float32)
            z2s = z2
            devs = ()
        samples = _sample_call(z2s, self.mean, self.sq_mean, z1, devs,
                               var_mult=var_mult, tile_rows=self.tile_rows)
        return samples, z1, z2

    def sampled_params_modelwise(self, key, num_samples=1):
        k_max = _sample_k_max(self.tile_rows, self.rank)
        chunks, z1s, z2s = [], [], []
        remaining = num_samples
        while remaining > 0:
            kc = min(remaining, k_max)
            key, sub = jax.random.split(key)
            s, z1, z2 = self._draw_sample_chunk(sub, kc)
            chunks.append(s); z1s.append(z1); z2s.append(z2)
            remaining -= kc
        samples = chunks[0] if len(chunks) == 1 else jnp.concatenate(chunks, axis=0)
        z1 = z1s[0] if len(z1s) == 1 else jnp.concatenate(z1s, axis=0)
        z2 = z2s[0] if len(z2s) == 1 else jnp.concatenate(z2s, axis=0)
        params = [self.unflatten_params(samples[k]) for k in range(num_samples)]
        return params, (z1, z2)

    # TODO(synk): layerwise / channelwise sampling, reduce_rank, nn.Module
    # deepcopy / state_dict / .to() plumbing are host-side bookkeeping, not kernel work.


# ----------------------------------------------------------------------------
# Pure-JAX references for verification
# ----------------------------------------------------------------------------
def _ref_forward(x, w1, w2):
    return jnp.maximum(x @ w1.T, 0.0) @ w2.T


if __name__ == "__main__":
    key = jax.random.PRNGKey(0)
    k_w1, k_w2, k_x, k_s = jax.random.split(key, 4)

    # Base model: Linear(128 -> 512, no bias) -> ReLU -> Linear(512 -> 128, no bias)
    # num_parameters = 512*128 + 128*512 = 131072 -> (1024, 128) layout, tile 512, grid (2,).
    in_f, hid, out_f, batch = 128, 512, 128, 8
    w1 = 0.1 * jax.random.normal(k_w1, (hid, in_f), jnp.float32)   # (out, in)
    w2 = 0.1 * jax.random.normal(k_w2, (out_f, hid), jnp.float32)  # (out, in)
    x = jax.random.normal(k_x, (batch, in_f), jnp.float32)

    swag = SWAGPallas(param_shapes=[(hid, in_f), (out_f, hid)], max_rank=8)
    P = swag.num_parameters

    # Collect three deterministic "SGD snapshots"; reference moments in flat f32.
    ref_mean = jnp.zeros((P,), jnp.float32)
    ref_sq = jnp.zeros((P,), jnp.float32)
    ref_devs = []
    for i in range(3):
        params_i = (w1 + 0.01 * i, w2 - 0.01 * i)
        swag.collect_model(params_i)
        wflat = jnp.concatenate([p.reshape(-1) for p in params_i])
        ref_mean = ref_mean * (i / (i + 1.0)) + wflat / (i + 1.0)
        ref_sq = ref_sq * (i / (i + 1.0)) + wflat ** 2 / (i + 1.0)
        ref_devs.append(wflat - ref_mean)

    assert np.allclose(np.asarray(swag.mean).ravel()[:P], np.asarray(ref_mean), atol=1e-5)
    assert np.allclose(np.asarray(swag.sq_mean).ravel()[:P], np.asarray(ref_sq), atol=1e-5)
    for d_got, d_ref in zip(swag.deviations, ref_devs[-swag.max_rank:]):
        assert np.allclose(np.asarray(d_got).ravel()[:P], np.asarray(d_ref), atol=1e-5)

    # Batched modelwise sampling (K posterior draws per kernel pass).
    K = 3
    sampled, (z1, z2) = swag.sampled_params_modelwise(k_s, num_samples=K)
    rank = swag.rank
    var2d = jnp.maximum(swag.sq_mean - swag.mean ** 2, F32_TINY)
    dev_stack = jnp.stack(swag.deviations)                      # (rank, rows_pad, 128)
    lowrank_scale = 1.0 / (2.0 * (rank - 1)) ** 0.5
    for k in range(K):
        ref_s = (swag.mean + jnp.sqrt(var2d / 2.0) * z1[k]
                 + jnp.einsum('r,rab->ab', z2[k], dev_stack) * lowrank_scale)
        got = np.concatenate([np.asarray(p).ravel() for p in sampled[k]])
        assert np.allclose(got, np.asarray(ref_s).ravel()[:P], atol=1e-4)

    # Forward pass through the sampled / averaged base model (transposes hoisted:
    # prepare_mlp_weights once per model, reused across forwards).
    s_w1, s_w2 = sampled[0]
    s_w1t, s_w2t = prepare_mlp_weights(s_w1, s_w2)
    y_sampled = mlp_forward(x, s_w1t, s_w2t)
    a_w1, a_w2 = swag.averaged_params()
    a_w1t, a_w2t = prepare_mlp_weights(a_w1, a_w2)
    y_avg = mlp_forward(x, a_w1t, a_w2t)

    jax.block_until_ready((y_sampled, y_avg))
    assert y_sampled.shape == (batch, out_f) and y_avg.shape == (batch, out_f)
    assert np.allclose(np.asarray(y_sampled),
                       np.asarray(_ref_forward(x, s_w1, s_w2)), atol=5e-3, rtol=1e-3)
    assert np.allclose(np.asarray(y_avg),
                       np.asarray(_ref_forward(x, a_w1, a_w2)), atol=5e-3, rtol=1e-3)
    assert np.isfinite(np.asarray(y_sampled)).all()

    print("KERNEL_OK")
</pallas_src>

<mosaic_0001>
module attributes {stable_mosaic.version = 11 : i64} {
  func.func @_collect_kernel(%arg0: i32, %arg1: memref<2xf32, #tpu.memory_space<smem>>, %arg2: memref<512x128xf32, #tpu.memory_space<vmem>>, %arg3: memref<512x128xf32, #tpu.memory_space<vmem>>, %arg4: memref<512x128xf32, #tpu.memory_space<vmem>>, %arg5: memref<512x128xf32, #tpu.memory_space<vmem>>, %arg6: memref<512x128xf32, #tpu.memory_space<vmem>>, %arg7: memref<512x128xf32, #tpu.memory_space<vmem>>) attributes {dimension_semantics = [#tpu.dimension_semantics<parallel>], iteration_bounds = array<i64: 2>, scalar_prefetch = 0 : i64, scratch_operands = 0 : i64, tpu.core_type = #tpu.core_type<tc>, window_params = [{transform_indices = @transform_0, window_bounds = array<i64: 2>}, {transform_indices = @transform_1, window_bounds = array<i64: 512, 128>}, {transform_indices = @transform_2, window_bounds = array<i64: 512, 128>}, {transform_indices = @transform_3, window_bounds = array<i64: 512, 128>}, {transform_indices = @transform_4, window_bounds = array<i64: 512, 128>}, {transform_indices = @transform_5, window_bounds = array<i64: 512, 128>}, {transform_indices = @transform_6, window_bounds = array<i64: 512, 128>}]} {
    %c0 = arith.constant 0 : index
    %0 = memref.load %arg1[%c0] : memref<2xf32, #tpu.memory_space<smem>>
    %c1 = arith.constant 1 : index
    %1 = memref.load %arg1[%c1] : memref<2xf32, #tpu.memory_space<smem>>
    %c0_0 = arith.constant 0 : index
    %c0_1 = arith.constant 0 : index
    %2 = vector.load %arg2[%c0_0, %c0_1] : memref<512x128xf32, #tpu.memory_space<vmem>>, vector<512x128xf32>
    %c0_2 = arith.constant 0 : index
    %c0_3 = arith.constant 0 : index
    %3 = vector.load %arg3[%c0_2, %c0_3] : memref<512x128xf32, #tpu.memory_space<vmem>>, vector<512x128xf32>
    %4 = vector.broadcast %0 : f32 to vector<512x128xf32>
    %5 = arith.mulf %3, %4 : vector<512x128xf32>
    %6 = vector.broadcast %1 : f32 to vector<512x128xf32>
    %7 = arith.mulf %2, %6 : vector<512x128xf32>
    %8 = arith.addf %5, %7 : vector<512x128xf32>
    %c0_4 = arith.constant 0 : index
    %c0_5 = arith.constant 0 : index
    %9 = vector.load %arg5[%c0_4, %c0_5] : memref<512x128xf32, #tpu.memory_space<vmem>>, vector<512x128xf32>
    tpu.vector_store %arg5[%c0_4, %c0_5], %8 {strides = array<i32>} : memref<512x128xf32, #tpu.memory_space<vmem>>, vector<512x128xf32>,
    %c0_6 = arith.constant 0 : index
    %c0_7 = arith.constant 0 : index
    %10 = vector.load %arg4[%c0_6, %c0_7] : memref<512x128xf32, #tpu.memory_space<vmem>>, vector<512x128xf32>
    %11 = vector.broadcast %0 : f32 to vector<512x128xf32>
    %12 = arith.mulf %10, %11 : vector<512x128xf32>
    %13 = arith.mulf %2, %2 : vector<512x128xf32>
    %14 = vector.broadcast %1 : f32 to vector<512x128xf32>
    %15 = arith.mulf %13, %14 : vector<512x128xf32>
    %16 = arith.addf %12, %15 : vector<512x128xf32>
    %c0_8 = arith.constant 0 : index
    %c0_9 = arith.constant 0 : index
    %17 = vector.load %arg6[%c0_8, %c0_9] : memref<512x128xf32, #tpu.memory_space<vmem>>, vector<512x128xf32>
    tpu.vector_store %arg6[%c0_8, %c0_9], %16 {strides = array<i32>} : memref<512x128xf32, #tpu.memory_space<vmem>>, vector<512x128xf32>,
    %18 = arith.subf %2, %8 : vector<512x128xf32>
    %c0_10 = arith.constant 0 : index
    %c0_11 = arith.constant 0 : index
    %19 = vector.load %arg7[%c0_10, %c0_11] : memref<512x128xf32, #tpu.memory_space<vmem>>, vector<512x128xf32>
    tpu.vector_store %arg7[%c0_10, %c0_11], %18 {strides = array<i32>} : memref<512x128xf32, #tpu.memory_space<vmem>>, vector<512x128xf32>,
    return
  }
  func.func @transform_0(%arg0: i32) -> i32 {
    %c0_i32 = arith.constant 0 : i32
    %c0_i32_0 = arith.constant 0 : i32
    return %c0_i32 : i32
  }
  func.func @transform_1(%arg0: i32) -> (i32, i32) {
    %c0_i32 = arith.constant 0 : i32
    %c0_i32_0 = arith.constant 0 : i32
    return %arg0, %c0_i32 : i32, i32
  }
  func.func @transform_2(%arg0: i32) -> (i32, i32) {
    %c0_i32 = arith.constant 0 : i32
    %c0_i32_0 = arith.constant 0 : i32
    return %arg0, %c0_i32 : i32, i32
  }
  func.func @transform_3(%arg0: i32) -> (i32, i32) {
    %c0_i32 = arith.constant 0 : i32
    %c0_i32_0 = arith.constant 0 : i32
    return %arg0, %c0_i32 : i32, i32
  }
  func.func @transform_4(%arg0: i32) -> (i32, i32) {
    %c0_i32 = arith.constant 0 : i32
    %c0_i32_0 = arith.constant 0 : i32
    return %arg0, %c0_i32 : i32, i32
  }
  func.func @transform_5(%arg0: i32) -> (i32, i32) {
    %c0_i32 = arith.constant 0 : i32
    %c0_i32_0 = arith.constant 0 : i32
    return %arg0, %c0_i32 : i32, i32
  }
  func.func @transform_6(%arg0: i32) -> (i32, i32) {
    %c0_i32 = arith.constant 0 : i32
    %c0_i32_0 = arith.constant 0 : i32
    return %arg0, %c0_i32 : i32, i32
  }
}

</mosaic_0001>

<bundles_post_ra>
// kernel: _collect_step.1
= control target key start
LH: loop header
LB: loop body
LE: loop exit
PB: predicated region body
PF: predicated region fallthrough
CT: control target
= control target key end

     0   :  { %s3591_s0 = inlined_call_operand.hbm [shape: f32[2], index: 0, kind: input, shape index: {}]   ;;  %s3592_s1 = inlined_call_operand.hbm [shape: f32[1024,128], index: 1, kind: input, shape index: {}]   ;;  %s3593_s2 = inlined_call_operand.hbm [shape: f32[1024,128], index: 2, kind: input, shape index: {}, may-alias: {2,4}]   ;;  %s3594_s3 = inlined_call_operand.hbm [shape: f32[1024,128], index: 3, kind: input, shape index: {}, may-alias: {3,5}]   ;;  %s3595_s4 = inlined_call_operand.hbm [shape: f32[1024,128], index: 4, kind: output, shape index: {0}, may-alias: {2,4}]   ;;  %s3596_s5 = inlined_call_operand.hbm [shape: f32[1024,128], index: 5, kind: output, shape index: {1}, may-alias: {3,5}]   ;;  %s3597_s6 = inlined_call_operand.hbm [shape: f32[1024,128], index: 6, kind: output, shape index: {2}]  }
   0x1   :  { %3655 = sst [smem:[#allocation51_spill]] %s3591_s0 }
   0x2   :  { %3656 = sst [smem:[#allocation52_spill]] %s3593_s2 }
   0x3   :  { %12 = vsyncpa [#allocation5], 0 }
   0x4   :  { %13 = vsyncpa [#allocation3], 0 }
   0x5   :  { %15 = vsyncpa [#allocation3 + $0x1], 0 }
   0x6   :  { %16 = vsyncpa [#allocation8], 0 }
   0x7   :  { %18 = vsyncpa [#allocation8 + $0x1], 0 }
   0x8   :  { %19 = vsyncpa [#allocation4], 0 }
   0x9   :  { %21 = vsyncpa [#allocation4 + $0x1], 0 }
   0xa   :  { %22 = vsyncpa [#allocation12], 0 }
   0xb   :  { %24 = vsyncpa [#allocation12 + $0x1], 0  ;;  %s2000_s21 = smov 0   ;;  %s2002_s22 = smov 0  }
   0xc   :  { %s2004_s23 = smov 0   ;;  %s2006_s24 = smov 0  }
   0xd LB: > { %3657 = sst [smem:[#allocation19_spill]] %s1946_s21  ;;  %s2021_s25 = sadd.s32 1, %s1958_s24   ;;  %s1958_s24 = sphi %s2006_s24, %s3763_s24   ;;  %s1954_s23 = sphi %s2004_s23, %s3767_s23   ;;  %s1950_s22 = sphi %s2002_s22, %s3766_s22   ;;  %s1946_s21 = sphi %s2000_s21, %s3765_s21  }
   0xe   : > { %3658 = sst [smem:[#allocation20_spill]] %s1958_s24  ;;  %s58_s26 = sadd.s32 1, %s1954_s23 }
   0xf   : > { %3659 = sst [smem:[#allocation21_spill]] %s2021_s25  ;;  %s55_s27 = ssub.s32 %s1958_s24, %s2021_s25 }
  0x10   : > { %p65_p0 = scmp.ne.s32.totalorder %s1954_s23, %s1950_s22  ;;  %p56_p1 = scmp.eq.s32.totalorder %s55_s27, 0 }
  0x11   : > { %p66_p2 = scmp.eq.s32.totalorder %s1958_s24, 0  ;;  %p1622_p4 = scmp.lt.s32.totalorder %s1958_s24, 2 }
  0x12   : > { %s2032_s28 = scalar_select %p56_p1, %s1954_s23, %s58_s26  }
  0x13   : > { %p67_p5 = por %p66_p2, %p65_p0  ;;  %s3603_s29 = sand.u32 1, %s1954_s23  }
  0x14   : > { %3660 = sst [smem:[#allocation22_spill]] %s2032_s28  ;;  %s2040_s30 = sshll.u32 %s3603_s29, 9 }
  0x15   : > { %s2043_s7 = sshll.u32 %s1958_s24, 9  ;;  %p2045_p6 = pnand %p1622_p4, %p67_p5 }
  0x16   : > { %s257_s9 = sand.u32 1, %s1958_s24   ;;  %s3662_s2 = sld [smem:[#allocation52_spill]] }
  0x17   : > { %s261_s14 = scalar_lea.vmem [#allocation7], %s2040_s30  ;;  %s2055_s16 = scalar_lea.sflag [#allocation8], %s257_s9 }
  0x18   : > { %s269_s15 = sshll.u32 %s261_s14, 4  ;;  %p1723_p8 = pneg %p2045_p6  ;;  %s270_s15 = int_to_ptr.vmem [resolvable:$true] %s269_s15 }
  0x1c   : > { %s266_s12 = scalar_lea.hbm %s3662_s2, %s2043_s7  ;;  %s1726_s26 = scalar_lea.hbm %s3662_s2, 1024 }
  0x1d   : > { %s267_s13 = sshll.u32 %s266_s12, 4  ;;  %s268_s13 = int_to_ptr.hbm [resolvable:$true] %s267_s13 }
  0x1e   : > { %s1719_s17 = sshra.s32 %s268_s13, 4  ;;  %s1720_s17 = int_to_ptr.hbm [resolvable:$true] %s1719_s17 }
  0x1f   : > { %s1721_s18 = scalar_lea.hbm %s1720_s17, 512  ;;  %p1727_p11 = scmp.lt.s32.totalorder %s1720_s17, %s3662_s2 }
  0x20   : > { %p1722_p7 = scmp.ne.s32.totalorder %s1720_s17, %s1721_s18  ;;  %p1728_p12 = scmp.lt.s32.totalorder %s1726_s26, %s1721_s18 }
  0x22   : > { %p1724_p9 = pnand %p1723_p8, %p1722_p7  ;;  %p1729_p13 = por %p1728_p12, %p1727_p11 }
  0x24   : > { %p1725_p10 = pneg %p1724_p9 }
  0x26   : > { %p1730_p1 = pnand %p1729_p13, %p1725_p10 }
  0x28   : > { %1733 = shalt.err (!%p1730_p1)
}
  0x29   : > { %s3599_s9 = smov 128   ;;  %s3601_s11 = smov 8  }
  0x2a   : > { %1607 = dma.hbm_to_vmem [thread:$0]  (!%p2045_p6), %s268_s13, 8192, %s270_s15, %s2055_s16, %s3599_s9, %s3599_s9, %s3601_s11  }
  0x2b   : > { %s2075_s12 = sadd.s32 4294967295, %s1958_s24   ;;  %s3598_s14 = sadd.s32 4294967294, %s1958_s24  }
  0x2c   : > { %p71_p2 = scmp.ne.s32.totalorder %s1950_s22, %s1946_s21  ;;  %p72_p4 = scmp.eq.s32.totalorder %s2075_s12, 0 }
  0x2d   : > { %p147_p5 = scmp.eq.s32.totalorder %s2075_s12, 1  ;;  %p153_p7 = scmp.eq.s32.totalorder %s3598_s14, 1 }
  0x2e   : > { %p2086_p9 = por %p72_p4, %p71_p2  ;;  %p1543_p10 = scmp.ge.s32.totalorder %s1958_s24, 1 }
  0x2f   : > { %p2094_p11 = por %p147_p5, %p65_p0  ;;  %p2098_p12 = por %p153_p7, %p71_p2 }
  0x30   : > { %p212_p13 = scmp.lt.s32.totalorder %s1958_s24, 3  ;;  %s3667_s0 = sld [smem:[#allocation51_spill]] }
  0x31   : > { %s3665_s15 = scalar_select %p2098_p12, 1, 0 }
  0x32   : > { %p2106_p1 = pnand %p1543_p10, %p212_p13  ;;  %s244_s14 = scalar_lea.hbm %s3592_s1, %s2043_s7 }
  0x33   : > { %3666 = sst [smem:[#allocation23_spill]] %s3665_s15  ;;  %s245_s9 = sshll.u32 %s244_s14, 4  ;;  %s246_s9 = int_to_ptr.hbm [resolvable:$true] %s245_s9 }
  0x34   : > { %p1597_p0 = pneg %p2106_p1  ;;  %s239_s11 = scalar_lea.vmem [#allocation6], %s2040_s30 }
  0x35   : > { %s247_s29 = sshll.u32 %s239_s11, 4  ;;  %s1962_s2 = smov [#allocation2]   ;;  %s248_s29 = int_to_ptr.vmem [resolvable:$true] %s247_s29 }
  0x36   : > { %s224_s20 = sshll.u32 %s3667_s0, 4  ;;  %p1598_p2 = pnand %p1597_p0, %p72_p4  ;;  %s225_s20 = int_to_ptr.hbm [resolvable:$true] %s224_s20 }
  0x37   : > { %s288_s0 = scalar_lea.hbm %s3594_s3, %s2043_s7  ;;  %s3669_s28 = sand.u32 1, %s1954_s23  }
  0x38   : > { %1600 = dma.hbm_to_smem (!%p1598_p2), %s225_s20, 16, %s1962_s2, [#allocation5]  }
  0x39   : > { %s236_s25 = scalar_lea.sflag [#allocation3], %s3669_s28  ;;  %s1764_s24 = sshra.s32 %s246_s9, 4  ;;  %s1765_s24 = int_to_ptr.hbm [resolvable:$true] %s1764_s24 }
  0x3a   : > { %s1766_s27 = scalar_lea.hbm %s1765_s24, 512  ;;  %s1771_s10 = scalar_lea.hbm %s3592_s1, 1024 }
  0x3b   : > { %p1767_p5 = scmp.ne.s32.totalorder %s1765_s24, %s1766_s27  ;;  %p1772_p13 = scmp.lt.s32.totalorder %s1765_s24, %s3592_s1 }
  0x3c   : > { %p1773_p0 = scmp.lt.s32.totalorder %s1771_s10, %s1766_s27 }
  0x3d   : > { %p1769_p7 = pnand %p1767_p5, %p1723_p8 }
  0x3e   : > { %p1774_p2 = por %p1773_p0, %p1772_p13 }
  0x3f   : > { %p1770_p10 = pneg %p1769_p7 }
  0x41   : > { %p1775_p3 = pnand %p1774_p2, %p1770_p10 }
  0x43   : > { %1778 = shalt.err (!%p1775_p3)
}
  0x44   : > { %s3670_s2 = smov 8   ;;  %s3671_s28 = smov 128  }
  0x45   : > { %1604 = dma.hbm_to_vmem [thread:$0]  (!%p2045_p6), %s246_s9, 8192, %s248_s29, %s236_s25, %s3671_s28, %s3671_s28, %s3670_s2  }
  0x46   : > { %s289_s7 = sshll.u32 %s288_s0, 4  ;;  %s283_s20 = scalar_lea.vmem [#allocation9], %s2040_s30  ;;  %s290_s7 = int_to_ptr.hbm [resolvable:$true] %s289_s7 }
  0x47   : > { %s291_s18 = sshll.u32 %s283_s20, 4  ;;  %s1794_s19 = sshra.s32 %s290_s7, 4  ;;  %s292_s18 = int_to_ptr.vmem [resolvable:$true] %s291_s18  ;;  %s1795_s19 = int_to_ptr.hbm [resolvable:$true] %s1794_s19 }
  0x48   : > { %s1796_s21 = scalar_lea.hbm %s1795_s19, 512  ;;  %s1801_s27 = scalar_lea.hbm %s3594_s3, 1024 }
  0x49   : > { %p1797_p5 = scmp.ne.s32.totalorder %s1795_s19, %s1796_s21  ;;  %p1802_p10 = scmp.lt.s32.totalorder %s1795_s19, %s3594_s3 }
  0x4a   : > { %p1803_p13 = scmp.lt.s32.totalorder %s1801_s27, %s1796_s21 }
  0x4b   : > { %p1799_p3 = pnand %p1797_p5, %p1723_p8 }
  0x4c   : > { %p1804_p0 = por %p1803_p13, %p1802_p10 }
  0x4d   : > { %p1800_p7 = pneg %p1799_p3 }
  0x4f   : > { %p1805_p2 = pnand %p1804_p0, %p1800_p7 }
  0x51   : > { %1808 = shalt.err (!%p1805_p2)
}
  0x52   : > { %1610 = dma.hbm_to_vmem [thread:$0]  (!%p2045_p6), %s290_s7, 8192, %s292_s18, %s2055_s16, %s3671_s28, %s3671_s28, %s3670_s2  }
  0x53   : > { %303 = sbr.rel (%p2106_p1) target bundleno = 371 (0x173), region = 36 }
  0x58   : > { %1925 = dma.done.wait (%p72_p4), [#allocation5], 16  }
  0x59   : > { %1927 = vsyncadd (%p72_p4), [#allocation5], 4294967280  ;;  %s2162_s0 = sand.u32 1, %s1950_s22  }
  0x5a   : > { %s2165_s25 = sshll.u32 %s2162_s0, 9  ;;  %s311_s29 = scalar_lea.sflag [#allocation3], %s2162_s0 }
  0x5b   : > { %s2169_s30 = scalar_lea.vmem [#allocation6], %s2165_s25 }
  0x5c   : > { %1929 = dma.done.wait (%p2086_p9), %s311_s29, 8192  }
  0x5d   : > { %1931 = vsyncadd (%p2086_p9), %s311_s29, 4294959104  ;;  %s320_s8 = sand.u32 1, %s2075_s12   ;;  %s2179_s9 = scalar_lea.vmem [#allocation7], %s2165_s25 }
  0x5e   : > { %s321_s16 = scalar_lea.sflag [#allocation8], %s320_s8 }
  0x5f   : > { %1933 = dma.done.wait (%p2086_p9), %s321_s16, 16384  }
  0x60   : > { %1935 = vsyncadd (%p2086_p9), %s321_s16, 4294950912  ;;  %s2186_s26 = scalar_lea.vmem [#allocation9], %s2165_s25 }
  0x61   : > { %340 = sfence }
  0x62   : > { %s391_s10 = sld [smem:[#allocation2]]  ;;  %v2189_v0 = vld [vmem:[%s2169_s30] sm:$0xff]  ;;  %v2192_v1 = vld [vmem:[%s2169_s30 + $0x8] sm:$0xff]  ;;  %v2195_v2 = vld [vmem:[%s2169_s30 + $0x10] sm:$0xff]  ;;  %s2270_s17 = scalar_lea.vmem [#allocation11], %s2165_s25 }
  0x63   : > { %s1563_s2 = sld [smem:[#allocation2 + $0x1]]  ;;  %v2198_v3 = vld [vmem:[%s2169_s30 + $0x18] sm:$0xff]  ;;  %v2201_v4 = vld [vmem:[%s2169_s30 + $0x20] sm:$0xff]  ;;  %v780_v6 = vld [vmem:[%s2186_s26 + $0x8] sm:$0xff]  ;;  %v907_v8 = vmul.f32 %v2189_v0, %v2189_v0  ;;  %v908_v9 = vmul.f32 %v2192_v1, %v2192_v1  ;;  %v909_v11 = vmul.f32 %v2195_v2, %v2195_v2  ;;  %s2803_s28 = scalar_lea.vmem [#allocation10], %s2165_s25 }
  0x64   : > { %v779_v5 = vld [vmem:[%s2186_s26] sm:$0xff]  ;;  %v2206_v7 = vld [vmem:[%s2169_s30 + $0x28] sm:$0xff]  ;;  %v781_v10 = vld [vmem:[%s2186_s26 + $0x10] sm:$0xff]  ;;  %v910_v15 = vmul.f32 %v2198_v3, %v2198_v3  ;;  %v911_v16 = vmul.f32 %v2201_v4, %v2201_v4  ;;  %s3295_s7 = scalar_lea.vmem [#allocation13], %s2165_s25  ;;  %s3448_s20 = sshll.u32 %s2075_s12, 9 }
  0x65   : > { %v2216_v12 = vld [vmem:[%s2169_s30 + $0x30] sm:$0xff]  ;;  %v2219_v13 = vld [vmem:[%s2169_s30 + $0x38] sm:$0xff]  ;;  %v912_v17 = vmul.f32 %v2206_v7, %v2206_v7  ;;  %v2229_v18 = vld [vmem:[%s2169_s30 + $0x40] sm:$0xff]  ;;  %s1330_s21 = scalar_lea.hbm %s3596_s5, %s3448_s20  ;;  %s1331_s24 = sshll.u32 %s2270_s17, 4  ;;  %s3492_s24 = int_to_ptr.vmem [resolvable:$true] %s1331_s24 }
  0x66   : > { %v782_v14 = vld [vmem:[%s2186_s26 + $0x18] sm:$0xff]  ;;  %v783_v20 = vld [vmem:[%s2186_s26 + $0x20] sm:$0xff]  ;;  %v784_v21 = vld [vmem:[%s2186_s26 + $0x28] sm:$0xff]  ;;  %v913_v22 = vmul.f32 %v2216_v12, %v2216_v12  ;;  %v914_v23 = vmul.f32 %v2219_v13, %v2219_v13  ;;  %v915_v24 = vmul.f32 %v2229_v18, %v2229_v18  ;;  %s3473_s15 = sshll.u32 %s1330_s21, 4  ;;  %s1313_s14 = scalar_lea.hbm %s3595_s4, %s3448_s20  ;;  %s1334_s15 = int_to_ptr.hbm [resolvable:$true] %s3473_s15 }
  0x67   : > { %v785_v33 = vld [vmem:[%s2186_s26 + $0x30] sm:$0xff]  ;;  %v786_v38 = vld [vmem:[%s2186_s26 + $0x38] sm:$0xff]  ;;  %v787_v39 = vld [vmem:[%s2186_s26 + $0x40] sm:$0xff]  ;;  %s1314_s16 = sshll.u32 %s2803_s28, 4  ;;  %s1844_s19 = scalar_lea.hbm %s3596_s5, 1024  ;;  %s3507_s16 = int_to_ptr.vmem [resolvable:$true] %s1314_s16 }
  0x68   : > { %v2231_v19 = vstv %s391_s10  ;;  %v2259_v44 = vld [vmem:[%s2169_s30 + $0x48] sm:$0xff]  ;;  %v2265_v50 = vld [vmem:[%s2169_s30 + $0x50] sm:$0xff]  ;;  %v790_v52 = vld [vmem:[%s2186_s26 + $0x58] sm:$0xff]  ;;  %s1348_s10 = sshll.u32 %s3295_s7, 4  ;;  %s3512_s10 = int_to_ptr.vmem [resolvable:$true] %s1348_s10 }
  0x69   : > { %v2241_v25 = vstv %s1563_s2  ;;  %v843_v26 = vmul.f32 %v779_v5, %v2231_v19  ;;  %v844_v27 = vmul.f32 %v780_v6, %v2231_v19  ;;  %v845_v28 = vmul.f32 %v781_v10, %v2231_v19  ;;  %v788_v45 = vld [vmem:[%s2186_s26 + $0x48] sm:$0xff]  ;;  %v789_v51 = vld [vmem:[%s2186_s26 + $0x50] sm:$0xff]  ;;  %v2277_v57 = vld [vmem:[%s2169_s30 + $0x58] sm:$0xff]  ;;  %s3516_s2 = scalar_lea.sflag [#allocation12], %s320_s8 }
  0x6a   : > { %v971_v29 = vmul.f32 %v907_v8, %v2241_v25  ;;  %v972_v30 = vmul.f32 %v908_v9, %v2241_v25  ;;  %v973_v31 = vmul.f32 %v909_v11, %v2241_v25  ;;  %v846_v32 = vmul.f32 %v782_v14, %v2231_v19  ;;  %v791_v58 = vld [vmem:[%s2186_s26 + $0x60] sm:$0xff]  ;;  %v2289_v5 = vld [vmem:[%s2169_s30 + $0x68] sm:$0xff]  ;;  %v2298_v14 = vld [vmem:[%s2169_s30 + $0x70] sm:$0xff] }
  0x6b   : > { %v974_v34 = vmul.f32 %v910_v15, %v2241_v25  ;;  %v847_v35 = vmul.f32 %v783_v20, %v2231_v19  ;;  %v975_v36 = vmul.f32 %v911_v16, %v2241_v25  ;;  %v848_v37 = vmul.f32 %v784_v21, %v2231_v19  ;;  %v2286_v63 = vld [vmem:[%s2169_s30 + $0x60] sm:$0xff]  ;;  %v792_v6 = vld [vmem:[%s2186_s26 + $0x68] sm:$0xff]  ;;  %v793_v15 = vld [vmem:[%s2186_s26 + $0x70] sm:$0xff] }
  0x6c   : > { %v1035_v40 = vadd.f32 %v971_v29, %v843_v26  ;;  %v1036_v41 = vadd.f32 %v972_v30, %v844_v27  ;;  %v1037_v42 = vadd.f32 %v973_v31, %v845_v28  ;;  %v976_v43 = vmul.f32 %v912_v17, %v2241_v25  ;;  %v2315_v28 = vld [vmem:[%s2169_s30 + $0x78] sm:$0xff]  ;;  %v795_v29 = vld [vmem:[%s2186_s26 + $0x80] sm:$0xff] }
  0x6d   : > { %v1038_v46 = vadd.f32 %v974_v34, %v846_v32  ;;  %v1039_v47 = vadd.f32 %v975_v36, %v847_v35  ;;  %v849_v48 = vmul.f32 %v785_v33, %v2231_v19  ;;  %v977_v49 = vmul.f32 %v913_v22, %v2241_v25  ;;  %v794_v22 = vld [vmem:[%s2186_s26 + $0x78] sm:$0xff]  ;;  %v2324_v34 = vld [vmem:[%s2169_s30 + $0x80] sm:$0xff]  ;;  %v796_v35 = vld [vmem:[%s2186_s26 + $0x88] sm:$0xff] }
  0x6e   : > { %1099 = vst [vmem:[%s2270_s17] sm:$0xff] %v1035_v40  ;;  %v1040_v53 = vadd.f32 %v976_v43, %v848_v37  ;;  %v850_v54 = vmul.f32 %v786_v38, %v2231_v19  ;;  %v978_v55 = vmul.f32 %v914_v23, %v2241_v25  ;;  %v851_v56 = vmul.f32 %v787_v39, %v2231_v19  ;;  %v2332_v40 = vld [vmem:[%s2169_s30 + $0x88] sm:$0xff] }
  0x6f   : > { %1100 = vst [vmem:[%s2270_s17 + $0x8] sm:$0xff] %v1036_v41  ;;  %v1041_v59 = vadd.f32 %v977_v49, %v849_v48  ;;  %v979_v60 = vmul.f32 %v915_v24, %v2241_v25  ;;  %v852_v61 = vmul.f32 %v788_v45, %v2231_v19  ;;  %v916_v62 = vmul.f32 %v2259_v44, %v2259_v44  ;;  %v797_v41 = vld [vmem:[%s2186_s26 + $0x90] sm:$0xff]  ;;  %v2344_v48 = vld [vmem:[%s2169_s30 + $0x98] sm:$0xff] }
  0x70   : > { %1101 = vst [vmem:[%s2270_s17 + $0x10] sm:$0xff] %v1037_v42  ;;  %v1042_v8 = vadd.f32 %v978_v55, %v850_v54  ;;  %v853_v9 = vmul.f32 %v789_v51, %v2231_v19  ;;  %v917_v10 = vmul.f32 %v2265_v50, %v2265_v50  ;;  %v854_v11 = vmul.f32 %v790_v52, %v2231_v19  ;;  %v798_v49 = vld [vmem:[%s2186_s26 + $0x98] sm:$0xff]  ;;  %v2352_v55 = vld [vmem:[%s2169_s30 + $0xa0] sm:$0xff] }
  0x71   : > { %1102 = vst [vmem:[%s2270_s17 + $0x18] sm:$0xff] %v1038_v46  ;;  %v1043_v16 = vadd.f32 %v979_v60, %v851_v56  ;;  %v980_v17 = vmul.f32 %v916_v62, %v2241_v25  ;;  %v918_v20 = vmul.f32 %v2277_v57, %v2277_v57  ;;  %v855_v21 = vmul.f32 %v791_v58, %v2231_v19  ;;  %v799_v56 = vld [vmem:[%s2186_s26 + $0xa0] sm:$0xff]  ;;  %v800_v62 = vld [vmem:[%s2186_s26 + $0xa8] sm:$0xff] }
  0x72   : > { %1103 = vst [vmem:[%s2270_s17 + $0x20] sm:$0xff] %v1039_v47  ;;  %v981_v23 = vmul.f32 %v917_v10, %v2241_v25  ;;  %v919_v24 = vmul.f32 %v2286_v63, %v2286_v63  ;;  %v856_v26 = vmul.f32 %v792_v6, %v2231_v19  ;;  %v920_v27 = vmul.f32 %v2289_v5, %v2289_v5  ;;  %v2341_v47 = vld [vmem:[%s2169_s30 + $0x90] sm:$0xff] }
  0x73   : > { %1104 = vst [vmem:[%s2270_s17 + $0x28] sm:$0xff] %v1040_v53  ;;  %v1044_v30 = vadd.f32 %v980_v17, %v852_v61  ;;  %v982_v31 = vmul.f32 %v918_v20, %v2241_v25  ;;  %v857_v32 = vmul.f32 %v793_v15, %v2231_v19  ;;  %v921_v33 = vmul.f32 %v2298_v14, %v2298_v14  ;;  %v801_v15 = vld [vmem:[%s2186_s26 + $0xb0] sm:$0xff] }
  0x74   : > { %1105 = vst [vmem:[%s2270_s17 + $0x30] sm:$0xff] %v1041_v59  ;;  %v1045_v36 = vadd.f32 %v981_v23, %v853_v9  ;;  %v983_v37 = vmul.f32 %v919_v24, %v2241_v25  ;;  %v984_v38 = vmul.f32 %v920_v27, %v2241_v25  ;;  %v858_v39 = vmul.f32 %v794_v22, %v2231_v19  ;;  %v2378_v22 = vld [vmem:[%s2169_s30 + $0xb0] sm:$0xff]  ;;  %v802_v23 = vld [vmem:[%s2186_s26 + $0xb8] sm:$0xff] }
  0x75   : > { %1106 = vst [vmem:[%s2270_s17 + $0x38] sm:$0xff] %v1042_v8  ;;  %v1046_v42 = vadd.f32 %v982_v31, %v854_v11  ;;  %v985_v43 = vmul.f32 %v921_v33, %v2241_v25  ;;  %v922_v45 = vmul.f32 %v2315_v28, %v2315_v28  ;;  %v859_v46 = vmul.f32 %v795_v29, %v2231_v19  ;;  %v2369_v11 = vld [vmem:[%s2169_s30 + $0xa8] sm:$0xff]  ;;  %v803_v31 = vld [vmem:[%s2186_s26 + $0xc0] sm:$0xff] }
  0x76   : > { %1107 = vst [vmem:[%s2270_s17 + $0x40] sm:$0xff] %v1043_v16  ;;  %v1047_v51 = vadd.f32 %v983_v37, %v855_v21  ;;  %v1048_v52 = vadd.f32 %v984_v38, %v856_v26  ;;  %v923_v53 = vmul.f32 %v2324_v34, %v2324_v34  ;;  %v860_v54 = vmul.f32 %v796_v35, %v2231_v19  ;;  %v2395_v37 = vld [vmem:[%s2169_s30 + $0xc0] sm:$0xff]  ;;  %v2398_v38 = vld [vmem:[%s2169_s30 + $0xc8] sm:$0xff] }
  0x77   : > { %1108 = vst [vmem:[%s2270_s17 + $0x48] sm:$0xff] %v1044_v30  ;;  %v1049_v58 = vadd.f32 %v985_v43, %v857_v32  ;;  %v986_v59 = vmul.f32 %v922_v45, %v2241_v25  ;;  %v924_v60 = vmul.f32 %v2332_v40, %v2332_v40  ;;  %v861_v61 = vmul.f32 %v797_v41, %v2231_v19  ;;  %v2386_v30 = vld [vmem:[%s2169_s30 + $0xb8] sm:$0xff] }
  0x78   : > { %1109 = vst [vmem:[%s2270_s17 + $0x50] sm:$0xff] %v1045_v36  ;;  %v987_v6 = vmul.f32 %v923_v53, %v2241_v25  ;;  %v925_v8 = vmul.f32 %v2341_v47, %v2341_v47  ;;  %v862_v9 = vmul.f32 %v798_v49, %v2231_v19  ;;  %v926_v10 = vmul.f32 %v2344_v48, %v2344_v48  ;;  %v805_v49 = vld [vmem:[%s2186_s26 + $0xd0] sm:$0xff] }
  0x79   : > { %1110 = vst [vmem:[%s2270_s17 + $0x58] sm:$0xff] %v1046_v42  ;;  %v1050_v16 = vadd.f32 %v986_v59, %v858_v39  ;;  %v988_v17 = vmul.f32 %v924_v60, %v2241_v25  ;;  %v863_v20 = vmul.f32 %v799_v56, %v2231_v19  ;;  %v927_v21 = vmul.f32 %v2352_v55, %v2352_v55  ;;  %v804_v39 = vld [vmem:[%s2186_s26 + $0xc8] sm:$0xff]  ;;  %v806_v56 = vld [vmem:[%s2186_s26 + $0xd8] sm:$0xff] }
  0x7a   : > { %1111 = vst [vmem:[%s2270_s17 + $0x60] sm:$0xff] %v1047_v51  ;;  %v1051_v24 = vadd.f32 %v987_v6, %v859_v46  ;;  %v989_v26 = vmul.f32 %v925_v8, %v2241_v25  ;;  %v990_v27 = vmul.f32 %v926_v10, %v2241_v25  ;;  %v864_v29 = vmul.f32 %v800_v62, %v2231_v19  ;;  %v2406_v46 = vld [vmem:[%s2169_s30 + $0xd0] sm:$0xff]  ;;  %v2423_v62 = vld [vmem:[%s2169_s30 + $0xd8] sm:$0xff]  ;;  %v807_v6 = vld [vmem:[%s2186_s26 + $0xe0] sm:$0xff] }
  0x7b   : > { %1112 = vst [vmem:[%s2270_s17 + $0x68] sm:$0xff] %v1048_v52  ;;  %v1052_v32 = vadd.f32 %v988_v17, %v860_v54  ;;  %v991_v33 = vmul.f32 %v927_v21, %v2241_v25  ;;  %v928_v35 = vmul.f32 %v2369_v11, %v2369_v11  ;;  %v865_v36 = vmul.f32 %v801_v15, %v2231_v19  ;;  %v808_v17 = vld [vmem:[%s2186_s26 + $0xe8] sm:$0xff] }
  0x7c   : > { %1113 = vst [vmem:[%s2270_s17 + $0x70] sm:$0xff] %v1049_v58  ;;  %v1053_v41 = vadd.f32 %v989_v26, %v861_v61  ;;  %v1054_v42 = vadd.f32 %v990_v27, %v862_v9  ;;  %v929_v43 = vmul.f32 %v2378_v22, %v2378_v22  ;;  %v866_v45 = vmul.f32 %v802_v23, %v2231_v19  ;;  %v2440_v26 = vld [vmem:[%s2169_s30 + $0xe8] sm:$0xff]  ;;  %v809_v27 = vld [vmem:[%s2186_s26 + $0xf0] sm:$0xff] }
  0x7d   : > { %1114 = vst [vmem:[%s2270_s17 + $0x78] sm:$0xff] %v1050_v16  ;;  %v1055_v51 = vadd.f32 %v991_v33, %v863_v20  ;;  %v992_v52 = vmul.f32 %v928_v35, %v2241_v25  ;;  %v930_v53 = vmul.f32 %v2386_v30, %v2386_v30  ;;  %v867_v54 = vmul.f32 %v803_v31, %v2231_v19  ;;  %v2432_v16 = vld [vmem:[%s2169_s30 + $0xe0] sm:$0xff]  ;;  %v2449_v35 = vld [vmem:[%s2169_s30 + $0xf0] sm:$0xff] }
  0x7e   : > { %1115 = vst [vmem:[%s2270_s17 + $0x80] sm:$0xff] %v1051_v24  ;;  %v993_v58 = vmul.f32 %v929_v43, %v2241_v25  ;;  %v931_v59 = vmul.f32 %v2395_v37, %v2395_v37  ;;  %v868_v60 = vmul.f32 %v804_v39, %v2231_v19  ;;  %v932_v61 = vmul.f32 %v2398_v38, %v2398_v38  ;;  %v810_v39 = vld [vmem:[%s2186_s26 + $0xf8] sm:$0xff] }
  0x7f   : > { %1116 = vst [vmem:[%s2270_s17 + $0x88] sm:$0xff] %v1052_v32  ;;  %v1056_v8 = vadd.f32 %v992_v52, %v864_v29  ;;  %v994_v9 = vmul.f32 %v930_v53, %v2241_v25  ;;  %v869_v10 = vmul.f32 %v805_v49, %v2231_v19  ;;  %v933_v15 = vmul.f32 %v2406_v46, %v2406_v46  ;;  %v2460_v49 = vld [vmem:[%s2169_s30 + $0x100] sm:$0xff] }
  0x80   : > { %1117 = vst [vmem:[%s2270_s17 + $0x90] sm:$0xff] %v1053_v41  ;;  %v1057_v20 = vadd.f32 %v993_v58, %v865_v36  ;;  %v995_v21 = vmul.f32 %v931_v59, %v2241_v25  ;;  %v996_v23 = vmul.f32 %v932_v61, %v2241_v25  ;;  %v870_v24 = vmul.f32 %v806_v56, %v2231_v19  ;;  %v2452_v36 = vld [vmem:[%s2169_s30 + $0xf8] sm:$0xff]  ;;  %v811_v52 = vld [vmem:[%s2186_s26 + $0x100] sm:$0xff]  ;;  %v812_v58 = vld [vmem:[%s2186_s26 + $0x108] sm:$0xff] }
  0x81   : > { %1118 = vst [vmem:[%s2270_s17 + $0x98] sm:$0xff] %v1054_v42  ;;  %v1058_v29 = vadd.f32 %v994_v9, %v866_v45  ;;  %v997_v31 = vmul.f32 %v933_v15, %v2241_v25  ;;  %v934_v32 = vmul.f32 %v2423_v62, %v2423_v62  ;;  %v871_v33 = vmul.f32 %v807_v6, %v2231_v19  ;;  %v813_v9 = vld [vmem:[%s2186_s26 + $0x110] sm:$0xff] }
  0x82   : > { %1119 = vst [vmem:[%s2270_s17 + $0xa0] sm:$0xff] %v1055_v51  ;;  %v1059_v41 = vadd.f32 %v995_v21, %v867_v54  ;;  %v1060_v43 = vadd.f32 %v996_v23, %v868_v60  ;;  %v935_v42 = vmul.f32 %v2432_v16, %v2432_v16  ;;  %v872_v45 = vmul.f32 %v808_v17, %v2231_v19  ;;  %v2486_v21 = vld [vmem:[%s2169_s30 + $0x110] sm:$0xff]  ;;  %v814_v23 = vld [vmem:[%s2186_s26 + $0x118] sm:$0xff] }
  0x83   : > { %1120 = vst [vmem:[%s2270_s17 + $0xa8] sm:$0xff] %v1056_v8  ;;  %v1061_v53 = vadd.f32 %v997_v31, %v869_v10  ;;  %v998_v56 = vmul.f32 %v934_v32, %v2241_v25  ;;  %v936_v51 = vmul.f32 %v2440_v26, %v2440_v26  ;;  %v873_v54 = vmul.f32 %v809_v27, %v2231_v19  ;;  %v2477_v8 = vld [vmem:[%s2169_s30 + $0x108] sm:$0xff]  ;;  %v2494_v32 = vld [vmem:[%s2169_s30 + $0x118] sm:$0xff] }
  0x84   : > { %1121 = vst [vmem:[%s2270_s17 + $0xb0] sm:$0xff] %v1057_v20  ;;  %v999_v59 = vmul.f32 %v935_v42, %v2241_v25  ;;  %v937_v60 = vmul.f32 %v2449_v35, %v2449_v35  ;;  %v874_v61 = vmul.f32 %v810_v39, %v2231_v19  ;;  %v938_v6 = vmul.f32 %v2452_v36, %v2452_v36  ;;  %v815_v39 = vld [vmem:[%s2186_s26 + $0x120] sm:$0xff] }
  0x85   : > { %1122 = vst [vmem:[%s2270_s17 + $0xb8] sm:$0xff] %v1058_v29  ;;  %v1062_v10 = vadd.f32 %v998_v56, %v870_v24  ;;  %v1000_v15 = vmul.f32 %v936_v51, %v2241_v25  ;;  %v875_v17 = vmul.f32 %v811_v52, %v2231_v19  ;;  %v939_v20 = vmul.f32 %v2460_v49, %v2460_v49  ;;  %v2503_v56 = vld [vmem:[%s2169_s30 + $0x120] sm:$0xff]  ;;  %v2506_v51 = vld [vmem:[%s2169_s30 + $0x128] sm:$0xff] }
  0x86   : > { %3672 = vst [vmem:[#allocation24_spill] sm:$0xff] %v2486_v21  ;;  %v1063_v27 = vadd.f32 %v999_v59, %v871_v33  ;;  %v1001_v31 = vmul.f32 %v937_v60, %v2241_v25  ;;  %v1002_v24 = vmul.f32 %v938_v6, %v2241_v25  ;;  %v876_v29 = vmul.f32 %v812_v58, %v2231_v19  ;;  %v816_v58 = vld [vmem:[%s2186_s26 + $0x128] sm:$0xff]  ;;  %v2514_v6 = vld [vmem:[%s2169_s30 + $0x130] sm:$0xff] }
  0x87   : > { %1123 = vst [vmem:[%s2270_s17 + $0xc0] sm:$0xff] %v1059_v41  ;;  %v1064_v42 = vadd.f32 %v1000_v15, %v872_v45  ;;  %v1003_v52 = vmul.f32 %v939_v20, %v2241_v25  ;;  %v940_v41 = vmul.f32 %v2477_v8, %v2477_v8  ;;  %v877_v33 = vmul.f32 %v813_v9, %v2231_v19  ;;  %v817_v9 = vld [vmem:[%s2186_s26 + $0x130] sm:$0xff] }
  0x88   : > { %3673 = vst [vmem:[#allocation25_spill] sm:$0xff] %v2494_v32  ;;  %v1065_v59 = vadd.f32 %v1001_v31, %v873_v54  ;;  %v1066_v60 = vadd.f32 %v1002_v24, %v874_v61  ;;  %v878_v45 = vmul.f32 %v814_v23, %v2231_v19  ;;  %v879_v54 = vmul.f32 %v815_v39, %v2231_v19  ;;  %v818_v61 = vld [vmem:[%s2186_s26 + $0x138] sm:$0xff] }
  0x89   : > { %1124 = vst [vmem:[%s2270_s17 + $0xc8] sm:$0xff] %v1060_v43  ;;  %v941_v43 = vmul.f32 %v2486_v21, %v2486_v21  ;;  %v1067_v15 = vadd.f32 %v1003_v52, %v875_v17  ;;  %v1004_v20 = vmul.f32 %v940_v41, %v2241_v25  ;;  %v943_v31 = vmul.f32 %v2503_v56, %v2503_v56  ;;  %v2531_v24 = vld [vmem:[%s2169_s30 + $0x138] sm:$0xff]  ;;  %v819_v52 = vld [vmem:[%s2186_s26 + $0x140] sm:$0xff] }
  0x8a   : > { %3674 = vst [vmem:[#allocation26_spill] sm:$0xff] %v2503_v56  ;;  %v944_v17 = vmul.f32 %v2506_v51, %v2506_v51  ;;  %v881_v41 = vmul.f32 %v817_v9, %v2231_v19  ;;  %v2548_v9 = vld [vmem:[%s2169_s30 + $0x148] sm:$0xff] }
  0x8b   : > { %3675 = vst [vmem:[#allocation27_spill] sm:$0xff] %v2506_v51  ;;  %v1005_v23 = vmul.f32 %v941_v43, %v2241_v25  ;;  %v1068_v39 = vadd.f32 %v1004_v20, %v876_v29  ;;  %v945_v43 = vmul.f32 %v2514_v6, %v2514_v6  ;;  %v820_v51 = vld [vmem:[%s2186_s26 + $0x148] sm:$0xff]  ;;  %v821_v20 = vld [vmem:[%s2186_s26 + $0x150] sm:$0xff] }
  0x8c   : > { %1125 = vst [vmem:[%s2270_s17 + $0xd0] sm:$0xff] %v1061_v53  ;;  %v942_v53 = vmul.f32 %v2494_v32, %v2494_v32  ;;  %v1007_v32 = vmul.f32 %v943_v31, %v2241_v25  ;;  %v1008_v29 = vmul.f32 %v944_v17, %v2241_v25  ;;  %v822_v31 = vld [vmem:[%s2186_s26 + $0x158] sm:$0xff] }
  0x8d   : > { %3676 = vst [vmem:[#allocation28_spill] sm:$0xff] %v2514_v6  ;;  %v1069_v56 = vadd.f32 %v1005_v23, %v877_v33  ;;  %v1009_v6 = vmul.f32 %v945_v43, %v2241_v25  ;;  %v883_v33 = vmul.f32 %v819_v52, %v2231_v19  ;;  %v2557_v23 = vld [vmem:[%s2169_s30 + $0x150] sm:$0xff]  ;;  %v823_v52 = vld [vmem:[%s2186_s26 + $0x160] sm:$0xff] }
  0x8e   : > { %1126 = vst [vmem:[%s2270_s17 + $0xd8] sm:$0xff] %v1062_v10  ;;  %v880_v10 = vmul.f32 %v816_v58, %v2231_v19  ;;  %v2540_v58 = vld [vmem:[%s2169_s30 + $0x140] sm:$0xff]  ;;  %v1071_v17 = vadd.f32 %v1007_v32, %v879_v54  ;;  %v948_v32 = vmul.f32 %v2548_v9, %v2548_v9  ;;  %v824_v54 = vld [vmem:[%s2186_s26 + $0x168] sm:$0xff] }
  0x8f   : > { %1127 = vst [vmem:[%s2270_s17 + $0xe0] sm:$0xff] %v1063_v27  ;;  %v1006_v27 = vmul.f32 %v942_v53, %v2241_v25  ;;  %v1073_v43 = vadd.f32 %v1009_v6, %v881_v41  ;;  %v2585_v41 = vld [vmem:[%s2169_s30 + $0x168] sm:$0xff] }
  0x90   : > { %3677 = vst [vmem:[#allocation29_spill] sm:$0xff] %v2531_v24  ;;  %v1072_v21 = vadd.f32 %v1008_v29, %v880_v10  ;;  %v949_v10 = vmul.f32 %v2557_v23, %v2557_v23  ;;  %v825_v29 = vld [vmem:[%s2186_s26 + $0x170] sm:$0xff] }
  0x91   : > { %1128 = vst [vmem:[%s2270_s17 + $0xe8] sm:$0xff] %v1064_v42  ;;  %v882_v42 = vmul.f32 %v818_v61, %v2231_v19  ;;  %v1070_v53 = vadd.f32 %v1006_v27, %v878_v45  ;;  %v2560_v61 = vld [vmem:[%s2169_s30 + $0x158] sm:$0xff]  ;;  %v884_v45 = vmul.f32 %v820_v51, %v2231_v19  ;;  %v2568_v27 = vld [vmem:[%s2169_s30 + $0x160] sm:$0xff] }
  0x92   : > { %3678 = vst [vmem:[#allocation30_spill] sm:$0xff] %v2540_v58  ;;  %v950_v6 = vmul.f32 %v2560_v61, %v2560_v61 }
  0x93   : > { %1129 = vst [vmem:[%s2270_s17 + $0xf0] sm:$0xff] %v1065_v59  ;;  %v946_v59 = vmul.f32 %v2531_v24, %v2531_v24 }
  0x94   : > { %3679 = vst [vmem:[#allocation31_spill] sm:$0xff] %v2548_v9  ;;  %v1013_v9 = vmul.f32 %v949_v10, %v2241_v25  ;;  %v828_v10 = vld [vmem:[%s2186_s26 + $0x188] sm:$0xff] }
  0x95   : > { %1130 = vst [vmem:[%s2270_s17 + $0xf8] sm:$0xff] %v1066_v60  ;;  %v947_v60 = vmul.f32 %v2540_v58, %v2540_v58  ;;  %v1010_v24 = vmul.f32 %v946_v59, %v2241_v25  ;;  %v887_v59 = vmul.f32 %v823_v52, %v2231_v19  ;;  %v827_v52 = vld [vmem:[%s2186_s26 + $0x180] sm:$0xff] }
  0x96   : > { %3680 = vst [vmem:[#allocation32_spill] sm:$0xff] %v2557_v23 }
  0x97   : > { %3681 = vst [vmem:[#allocation33_spill] sm:$0xff] %v2560_v61  ;;  %v1011_v51 = vmul.f32 %v947_v60, %v2241_v25  ;;  %v951_v60 = vmul.f32 %v2568_v27, %v2568_v27  ;;  %v826_v61 = vld [vmem:[%s2186_s26 + $0x178] sm:$0xff] }
  0x98   : > { %1131 = vst [vmem:[%s2270_s17 + $0x100] sm:$0xff] %v1067_v15  ;;  %v885_v15 = vmul.f32 %v821_v20, %v2231_v19  ;;  %v1074_v20 = vadd.f32 %v1010_v24, %v882_v42  ;;  %v1014_v24 = vmul.f32 %v950_v6, %v2241_v25  ;;  %v888_v42 = vmul.f32 %v824_v54, %v2231_v19  ;;  %v2614_v54 = vld [vmem:[%s2169_s30 + $0x188] sm:$0xff] }
  0x99   : > { %3682 = vst [vmem:[#allocation34_spill] sm:$0xff] %v2568_v27  ;;  %v1075_v23 = vadd.f32 %v1011_v51, %v883_v33  ;;  %v1015_v27 = vmul.f32 %v951_v60, %v2241_v25  ;;  %v889_v33 = vmul.f32 %v825_v29, %v2231_v19  ;;  %v2611_v51 = vld [vmem:[%s2169_s30 + $0x180] sm:$0xff]  ;;  %v829_v29 = vld [vmem:[%s2186_s26 + $0x190] sm:$0xff] }
  0x9a   : > { %1132 = vst [vmem:[%s2270_s17 + $0x108] sm:$0xff] %v1068_v39  ;;  %v886_v39 = vmul.f32 %v822_v31, %v2231_v19  ;;  %v2594_v31 = vld [vmem:[%s2169_s30 + $0x170] sm:$0xff]  ;;  %v1077_v6 = vadd.f32 %v1013_v9, %v885_v15  ;;  %v830_v15 = vld [vmem:[%s2186_s26 + $0x198] sm:$0xff] }
  0x9b   : > { %1133 = vst [vmem:[%s2270_s17 + $0x110] sm:$0xff] %v1069_v56  ;;  %v1012_v56 = vmul.f32 %v948_v32, %v2241_v25  ;;  %v1079_v60 = vadd.f32 %v1015_v27, %v887_v59  ;;  %v956_v27 = vmul.f32 %v2614_v54, %v2614_v54  ;;  %v2639_v59 = vld [vmem:[%s2169_s30 + $0x198] sm:$0xff] }
  0x9c   : > { %3683 = vst [vmem:[#allocation35_spill] sm:$0xff] %v2585_v41  ;;  %v1078_v58 = vadd.f32 %v1014_v24, %v886_v39  ;;  %v955_v39 = vmul.f32 %v2611_v51, %v2611_v51  ;;  %v831_v24 = vld [vmem:[%s2186_s26 + $0x1a0] sm:$0xff] }
  0x9d   : > { %1134 = vst [vmem:[%s2270_s17 + $0x118] sm:$0xff] %v1070_v53  ;;  %v2602_v53 = vld [vmem:[%s2169_s30 + $0x178] sm:$0xff]  ;;  %v1076_v32 = vadd.f32 %v1012_v56, %v884_v45  ;;  %v890_v45 = vmul.f32 %v826_v61, %v2231_v19  ;;  %v2622_v56 = vld [vmem:[%s2169_s30 + $0x190] sm:$0xff] }
  0x9e   : > { %3684 = vst [vmem:[#allocation36_spill] sm:$0xff] %v2594_v31  ;;  %v954_v9 = vmul.f32 %v2602_v53, %v2602_v53 }
  0x9f   : > { %1135 = vst [vmem:[%s2270_s17 + $0x120] sm:$0xff] %v1071_v17  ;;  %v952_v17 = vmul.f32 %v2585_v41, %v2585_v41 }
  0xa0   : > { %3685 = vst [vmem:[#allocation37_spill] sm:$0xff] %v2602_v53  ;;  %v1019_v53 = vmul.f32 %v955_v39, %v2241_v25  ;;  %v2668_v39 = vld [vmem:[%s2169_s30 + $0x1b8] sm:$0xff] }
  0xa1   : > { %1136 = vst [vmem:[%s2270_s17 + $0x128] sm:$0xff] %v1072_v21  ;;  %v953_v21 = vmul.f32 %v2594_v31, %v2594_v31  ;;  %v1016_v41 = vmul.f32 %v952_v17, %v2241_v25  ;;  %v893_v17 = vmul.f32 %v829_v29, %v2231_v19  ;;  %v833_v29 = vld [vmem:[%s2186_s26 + $0x1b0] sm:$0xff] }
  0xa2   : > { %3686 = vst [vmem:[#allocation38_spill] sm:$0xff] %v2611_v51 }
  0xa3   : > { %3687 = vst [vmem:[#allocation39_spill] sm:$0xff] %v2614_v54  ;;  %v1017_v61 = vmul.f32 %v953_v21, %v2241_v25  ;;  %v957_v21 = vmul.f32 %v2622_v56, %v2622_v56  ;;  %v832_v54 = vld [vmem:[%s2186_s26 + $0x1a8] sm:$0xff] }
  0xa4   : > { %1137 = vst [vmem:[%s2270_s17 + $0x130] sm:$0xff] %v1073_v43  ;;  %v891_v43 = vmul.f32 %v827_v52, %v2231_v19  ;;  %v1080_v52 = vadd.f32 %v1016_v41, %v888_v42  ;;  %v1020_v41 = vmul.f32 %v956_v27, %v2241_v25  ;;  %v894_v42 = vmul.f32 %v830_v15, %v2231_v19  ;;  %v834_v15 = vld [vmem:[%s2186_s26 + $0x1b8] sm:$0xff] }
  0xa5   : > { %3688 = vst [vmem:[#allocation40_spill] sm:$0xff] %v2622_v56  ;;  %v1081_v51 = vadd.f32 %v1017_v61, %v889_v33  ;;  %v1021_v56 = vmul.f32 %v957_v21, %v2241_v25  ;;  %v895_v33 = vmul.f32 %v831_v24, %v2231_v19  ;;  %v2665_v61 = vld [vmem:[%s2169_s30 + $0x1b0] sm:$0xff]  ;;  %v835_v24 = vld [vmem:[%s2186_s26 + $0x1c0] sm:$0xff] }
  0xa6   : > { %1138 = vst [vmem:[%s2270_s17 + $0x138] sm:$0xff] %v1074_v20  ;;  %v892_v20 = vmul.f32 %v828_v10, %v2231_v19  ;;  %v2648_v10 = vld [vmem:[%s2169_s30 + $0x1a0] sm:$0xff]  ;;  %v1083_v27 = vadd.f32 %v1019_v53, %v891_v43 }
  0xa7   : > { %1139 = vst [vmem:[%s2270_s17 + $0x140] sm:$0xff] %v1075_v23  ;;  %v1018_v23 = vmul.f32 %v954_v9, %v2241_v25  ;;  %v1085_v21 = vadd.f32 %v1021_v56, %v893_v17  ;;  %v962_v56 = vmul.f32 %v2668_v39, %v2668_v39  ;;  %v836_v17 = vld [vmem:[%s2186_s26 + $0x1c8] sm:$0xff] }
  0xa8   : > { %3689 = vst [vmem:[#allocation41_spill] sm:$0xff] %v2639_v59  ;;  %v1084_v31 = vadd.f32 %v1020_v41, %v892_v20  ;;  %v898_v20 = vmul.f32 %v834_v15, %v2231_v19  ;;  %v2701_v15 = vld [vmem:[%s2169_s30 + $0x1d0] sm:$0xff] }
  0xa9   : > { %1140 = vst [vmem:[%s2270_s17 + $0x148] sm:$0xff] %v1076_v32  ;;  %v2656_v32 = vld [vmem:[%s2169_s30 + $0x1a8] sm:$0xff]  ;;  %v1082_v9 = vadd.f32 %v1018_v23, %v890_v45  ;;  %v896_v45 = vmul.f32 %v832_v54, %v2231_v19  ;;  %v2676_v23 = vld [vmem:[%s2169_s30 + $0x1c0] sm:$0xff]  ;;  %v961_v54 = vmul.f32 %v2665_v61, %v2665_v61 }
  0xaa   : > { %1141 = vst [vmem:[%s2270_s17 + $0x150] sm:$0xff] %v1077_v6  ;;  %v958_v6 = vmul.f32 %v2639_v59, %v2639_v59  ;;  %v960_v53 = vmul.f32 %v2656_v32, %v2656_v32 }
  0xab   : > { %3690 = vst [vmem:[#allocation42_spill] sm:$0xff] %v2656_v32 }
  0xac   : > { %1142 = vst [vmem:[%s2270_s17 + $0x158] sm:$0xff] %v1078_v58  ;;  %v959_v58 = vmul.f32 %v2648_v10, %v2648_v10  ;;  %v1022_v59 = vmul.f32 %v958_v6, %v2241_v25  ;;  %v963_v6 = vmul.f32 %v2676_v23, %v2676_v23 }
  0xad   : > { %3691 = vst [vmem:[#allocation43_spill] sm:$0xff] %v2665_v61  ;;  %v1025_v61 = vmul.f32 %v961_v54, %v2241_v25  ;;  %v2721_v54 = vld [vmem:[%s2169_s30 + $0x1e8] sm:$0xff] }
  0xae   : > { %3692 = vst [vmem:[#allocation44_spill] sm:$0xff] %v2668_v39  ;;  %v1023_v43 = vmul.f32 %v959_v58, %v2241_v25  ;;  %v1086_v41 = vadd.f32 %v1022_v59, %v894_v42  ;;  %v837_v58 = vld [vmem:[%s2186_s26 + $0x1d0] sm:$0xff]  ;;  %v1026_v59 = vmul.f32 %v962_v56, %v2241_v25  ;;  %v2708_v42 = vld [vmem:[%s2169_s30 + $0x1d8] sm:$0xff] }
  0xaf   : > { %1143 = vst [vmem:[%s2270_s17 + $0x160] sm:$0xff] %v1079_v60  ;;  %v897_v60 = vmul.f32 %v833_v29, %v2231_v19  ;;  %v899_v29 = vmul.f32 %v835_v24, %v2231_v19 }
  0xb0   : > { %3693 = vst [vmem:[#allocation45_spill] sm:$0xff] %v2676_v23  ;;  %v1087_v39 = vadd.f32 %v1023_v43, %v895_v33  ;;  %v900_v23 = vmul.f32 %v836_v17, %v2231_v19  ;;  %v2717_v33 = vld [vmem:[%s2169_s30 + $0x1e0] sm:$0xff]  ;;  %v1090_v32 = vadd.f32 %v1026_v59, %v898_v20  ;;  %v840_v17 = vld [vmem:[%s2186_s26 + $0x1e8] sm:$0xff] }
  0xb1   : > { %1144 = vst [vmem:[%s2270_s17 + $0x168] sm:$0xff] %v1080_v52  ;;  %v2692_v52 = vld [vmem:[%s2169_s30 + $0x1c8] sm:$0xff]  ;;  %v839_v43 = vld [vmem:[%s2186_s26 + $0x1e0] sm:$0xff]  ;;  %v1089_v56 = vadd.f32 %v1025_v61, %v897_v60  ;;  %v966_v61 = vmul.f32 %v2708_v42, %v2708_v42  ;;  %v841_v60 = vld [vmem:[%s2186_s26 + $0x1f0] sm:$0xff]  ;;  %v967_v59 = vmul.f32 %v2717_v33, %v2717_v33 }
  0xb2   : > { %1145 = vst [vmem:[%s2270_s17 + $0x170] sm:$0xff] %v1081_v51  ;;  %v1024_v51 = vmul.f32 %v960_v53, %v2241_v25  ;;  %v1027_v53 = vmul.f32 %v963_v6, %v2241_v25 }
  0xb3   : > { %3694 = vst [vmem:[#allocation46_spill] sm:$0xff] %v2692_v52 }
  0xb4   : > { %1146 = vst [vmem:[%s2270_s17 + $0x178] sm:$0xff] %v1082_v9  ;;  %v838_v9 = vld [vmem:[%s2186_s26 + $0x1d8] sm:$0xff]  ;;  %v1088_v24 = vadd.f32 %v1024_v51, %v896_v45  ;;  %v965_v45 = vmul.f32 %v2701_v15, %v2701_v15  ;;  %v2729_v51 = vld [vmem:[%s2169_s30 + $0x1f0] sm:$0xff]  ;;  %v1091_v6 = vadd.f32 %v1027_v53, %v899_v29 }
  0xb5   : > { %3695 = vst [vmem:[#allocation47_spill] sm:$0xff] %v2701_v15  ;;  %v2745_v29 = vld [vmem:[%s2169_s30 + $0x1f8] sm:$0xff] }
  0xb6   : > { %1147 = vst [vmem:[%s2270_s17 + $0x180] sm:$0xff] %v1083_v27  ;;  %v964_v27 = vmul.f32 %v2692_v52, %v2692_v52  ;;  %v1029_v20 = vmul.f32 %v965_v45, %v2241_v25  ;;  %v842_v53 = vld [vmem:[%s2186_s26 + $0x1f8] sm:$0xff] }
  0xb7   : > { %3696 = vst [vmem:[#allocation48_spill] sm:$0xff] %v2708_v42 }
  0xb8   : > { %1148 = vst [vmem:[%s2270_s17 + $0x188] sm:$0xff] %v1084_v31  ;;  %v901_v31 = vmul.f32 %v837_v58, %v2231_v19  ;;  %v1028_v52 = vmul.f32 %v964_v27, %v2241_v25  ;;  %v903_v58 = vmul.f32 %v839_v43, %v2231_v19  ;;  %v904_v27 = vmul.f32 %v840_v17, %v2231_v19 }
  0xb9   : > { %3697 = vst [vmem:[#allocation49_spill] sm:$0xff] %v2717_v33  ;;  %v969_v43 = vmul.f32 %v2729_v51, %v2729_v51  ;;  %v906_v17 = vmul.f32 %v842_v53, %v2231_v19  ;;  %v460_v53 = vld [vmem:[%s2179_s9 + $0x18] sm:$0xff] }
  0xba   : > { %3698 = vst [vmem:[#allocation50_spill] sm:$0xff] %v2721_v54  ;;  %v1093_v45 = vadd.f32 %v1029_v20, %v901_v31  ;;  %v457_v31 = vld [vmem:[%s2179_s9] sm:$0xff]  ;;  %v458_v20 = vld [vmem:[%s2179_s9 + $0x8] sm:$0xff] }
  0xbb   : > { %1149 = vst [vmem:[%s2270_s17 + $0x190] sm:$0xff] %v1085_v21  ;;  %v902_v21 = vmul.f32 %v838_v9, %v2231_v19  ;;  %v1092_v9 = vadd.f32 %v1028_v52, %v900_v23  ;;  %v1033_v52 = vmul.f32 %v969_v43, %v2241_v25  ;;  %v525_v43 = vmul.f32 %v2231_v19, %v460_v53  ;;  %v468_v53 = vld [vmem:[%s2179_s9 + $0x58] sm:$0xff] }
  0xbc   : > { %1150 = vst [vmem:[%s2270_s17 + $0x198] sm:$0xff] %v1086_v41  ;;  %v968_v41 = vmul.f32 %v2721_v54, %v2721_v54  ;;  %v1031_v54 = vmul.f32 %v967_v59, %v2241_v25 }
  0xbd   : > { %1151 = vst [vmem:[%s2270_s17 + $0x1a0] sm:$0xff] %v1087_v39  ;;  %v1030_v39 = vmul.f32 %v966_v61, %v2241_v25 }
  0xbe   : > { %1152 = vst [vmem:[%s2270_s17 + $0x1a8] sm:$0xff] %v1088_v24  ;;  %v1032_v33 = vmul.f32 %v968_v41, %v2241_v25  ;;  %v905_v24 = vmul.f32 %v841_v60, %v2231_v19  ;;  %v1095_v61 = vadd.f32 %v1031_v54, %v903_v58  ;;  %v522_v41 = vmul.f32 %v2231_v19, %v457_v31  ;;  %v465_v31 = vld [vmem:[%s2179_s9 + $0x40] sm:$0xff] }
  0xbf   : > { %1153 = vst [vmem:[%s2270_s17 + $0x1b0] sm:$0xff] %v1089_v56  ;;  %v1094_v23 = vadd.f32 %v1030_v39, %v902_v21  ;;  %v970_v56 = vmul.f32 %v2745_v29, %v2745_v29  ;;  %v459_v21 = vld [vmem:[%s2179_s9 + $0x10] sm:$0xff]  ;;  %v588_v58 = vmul.f32 %v2241_v25, %v2192_v1 }
  0xc0   : > { %1154 = vst [vmem:[%s2270_s17 + $0x1b8] sm:$0xff] %v1090_v32  ;;  %v1096_v59 = vadd.f32 %v1032_v33, %v904_v27  ;;  %v1097_v60 = vadd.f32 %v1033_v52, %v905_v24  ;;  %v523_v33 = vmul.f32 %v2231_v19, %v458_v20  ;;  %v524_v39 = vmul.f32 %v2231_v19, %v459_v21  ;;  %v463_v24 = vld [vmem:[%s2179_s9 + $0x30] sm:$0xff] }
  0xc1   : > { %1155 = vst [vmem:[%s2270_s17 + $0x1c0] sm:$0xff] %v1091_v6  ;;  %v1034_v32 = vmul.f32 %v970_v56, %v2241_v25  ;;  %v587_v6 = vmul.f32 %v2241_v25, %v2189_v0  ;;  %v589_v27 = vmul.f32 %v2241_v25, %v2195_v2  ;;  %v462_v0 = vld [vmem:[%s2179_s9 + $0x28] sm:$0xff]  ;;  %v591_v52 = vmul.f32 %v2241_v25, %v2201_v4 }
  0xc2   : > { %1156 = vst [vmem:[%s2270_s17 + $0x1c8] sm:$0xff] %v1092_v9  ;;  %v461_v9 = vld [vmem:[%s2179_s9 + $0x20] sm:$0xff]  ;;  %v2796_v2 = vadd.f32 %v588_v58, %v523_v33  ;;  %v527_v56 = vmul.f32 %v2231_v19, %v462_v0  ;;  %v593_v20 = vmul.f32 %v2241_v25, %v2216_v12  ;;  %v594_v21 = vmul.f32 %v2241_v25, %v2219_v13 }
  0xc3   : > { %1157 = vst [vmem:[%s2270_s17 + $0x1d0] sm:$0xff] %v1093_v45  ;;  %v1098_v54 = vadd.f32 %v1034_v32, %v906_v17  ;;  %v590_v45 = vmul.f32 %v2241_v25, %v2198_v3  ;;  %v2789_v1 = vadd.f32 %v587_v6, %v522_v41  ;;  %v464_v17 = vld [vmem:[%s2179_s9 + $0x38] sm:$0xff]  ;;  %v592_v3 = vmul.f32 %v2241_v25, %v2206_v7  ;;  %v469_v58 = vld [vmem:[%s2179_s9 + $0x60] sm:$0xff] }
  0xc4   : > { %1158 = vst [vmem:[%s2270_s17 + $0x1d8] sm:$0xff] %v1094_v23  ;;  %v526_v23 = vmul.f32 %v2231_v19, %v461_v9  ;;  %v2807_v4 = vadd.f32 %v589_v27, %v524_v39  ;;  %v529_v32 = vmul.f32 %v2231_v19, %v464_v17  ;;  %v530_v12 = vmul.f32 %v2231_v19, %v465_v31  ;;  %v470_v27 = vld [vmem:[%s2179_s9 + $0x68] sm:$0xff] }
  0xc5   : > { %1159 = vst [vmem:[%s2270_s17 + $0x1e0] sm:$0xff] %v1095_v61  ;;  %v528_v61 = vmul.f32 %v2231_v19, %v463_v24  ;;  %v2815_v7 = vadd.f32 %v590_v45, %v525_v43  ;;  %v595_v6 = vmul.f32 %v2241_v25, %v2229_v18  ;;  %v596_v33 = vmul.f32 %v2241_v25, %v2259_v44  ;;  %v471_v45 = vld [vmem:[%s2179_s9 + $0x70] sm:$0xff] }
  0xc6   : > { %1160 = vst [vmem:[%s2270_s17 + $0x1e8] sm:$0xff] %v1096_v59  ;;  %v466_v59 = vld [vmem:[%s2179_s9 + $0x48] sm:$0xff]  ;;  %v2823_v41 = vadd.f32 %v591_v52, %v526_v23  ;;  %v597_v39 = vmul.f32 %v2241_v25, %v2265_v50  ;;  %v2847_v0 = vadd.f32 %v594_v21, %v529_v32  ;;  %v533_v44 = vmul.f32 %v2231_v19, %v468_v53  ;;  %v472_v52 = vld [vmem:[%s2179_s9 + $0x78] sm:$0xff]  ;;  %v475_v21 = vld [vmem:[%s2179_s9 + $0x90] sm:$0xff] }
  0xc7   : > { %1161 = vst [vmem:[%s2270_s17 + $0x1f0] sm:$0xff] %v1097_v60  ;;  %v467_v60 = vld [vmem:[%s2179_s9 + $0x50] sm:$0xff]  ;;  %v531_v13 = vmul.f32 %v2231_v19, %v466_v59  ;;  %v2839_v9 = vadd.f32 %v593_v20, %v528_v61  ;;  %v598_v43 = vmul.f32 %v2241_v25, %v2277_v57  ;;  %v2855_v24 = vadd.f32 %v595_v6, %v530_v12  ;;  %v474_v20 = vld [vmem:[%s2179_s9 + $0x88] sm:$0xff]  ;;  %v476_v6 = vld [vmem:[%s2179_s9 + $0x98] sm:$0xff] }
  0xc8   : > { %1162 = vst [vmem:[%s2270_s17 + $0x1f8] sm:$0xff] %v1098_v54  ;;  %v2831_v54 = vadd.f32 %v592_v3, %v527_v56  ;;  %v532_v18 = vmul.f32 %v2231_v19, %v467_v60  ;;  %v534_v50 = vmul.f32 %v2231_v19, %v469_v58  ;;  %v599_v23 = vmul.f32 %v2241_v25, %v2286_v63  ;;  %v473_v3 = vld [vmem:[%s2179_s9 + $0x80] sm:$0xff]  ;;  %s1838_s17 = sshra.s32 %s1334_s15, 4  ;;  %s1839_s17 = int_to_ptr.hbm [resolvable:$true] %s1838_s17 }
  0xc9   : > { %715 = vst [vmem:[%s2803_s28] sm:$0xff] %v2789_v1  ;;  %v2863_v17 = vadd.f32 %v596_v33, %v531_v13  ;;  %v535_v57 = vmul.f32 %v2231_v19, %v470_v27  ;;  %v600_v56 = vmul.f32 %v2241_v25, %v2289_v5  ;;  %v536_v63 = vmul.f32 %v2231_v19, %v471_v45  ;;  %v477_v33 = vld [vmem:[%s2179_s9 + $0xa0] sm:$0xff]  ;;  %p1845_p9 = scmp.lt.s32.totalorder %s1839_s17, %s3596_s5 }
  0xca   : > { %716 = vst [vmem:[%s2803_s28 + $0x8] sm:$0xff] %v2796_v2  ;;  %v2871_v31 = vadd.f32 %v597_v39, %v532_v18  ;;  %v601_v61 = vmul.f32 %v2241_v25, %v2298_v14  ;;  %v2879_v59 = vadd.f32 %v598_v43, %v533_v44  ;;  %v537_v5 = vmul.f32 %v2231_v19, %v472_v52  ;;  %v478_v39 = vld [vmem:[%s2179_s9 + $0xa8] sm:$0xff]  ;;  %v479_v43 = vld [vmem:[%s2179_s9 + $0xb0] sm:$0xff] }
  0xcb   : > { %717 = vst [vmem:[%s2803_s28 + $0x10] sm:$0xff] %v2807_v4  ;;  %v602_v32 = vmul.f32 %v2241_v25, %v2315_v28  ;;  %v2887_v60 = vadd.f32 %v599_v23, %v534_v50  ;;  %v538_v14 = vmul.f32 %v2231_v19, %v473_v3  ;;  %v603_v12 = vmul.f32 %v2241_v25, %v2324_v34  ;;  %v480_v23 = vld [vmem:[%s2179_s9 + $0xb8] sm:$0xff] }
  0xcc   : > { %718 = vst [vmem:[%s2803_s28 + $0x18] sm:$0xff] %v2815_v7  ;;  %v2895_v53 = vadd.f32 %v600_v56, %v535_v57  ;;  %v539_v28 = vmul.f32 %v2231_v19, %v474_v20  ;;  %v604_v13 = vmul.f32 %v2241_v25, %v2332_v40  ;;  %v2903_v58 = vadd.f32 %v601_v61, %v536_v63  ;;  %v481_v56 = vld [vmem:[%s2179_s9 + $0xc0] sm:$0xff]  ;;  %v482_v61 = vld [vmem:[%s2179_s9 + $0xc8] sm:$0xff] }
  0xcd   : > { %719 = vst [vmem:[%s2803_s28 + $0x20] sm:$0xff] %v2823_v41  ;;  %v540_v34 = vmul.f32 %v2231_v19, %v475_v21  ;;  %v605_v18 = vmul.f32 %v2241_v25, %v2341_v47  ;;  %v2911_v27 = vadd.f32 %v602_v32, %v537_v5  ;;  %v541_v40 = vmul.f32 %v2231_v19, %v476_v6  ;;  %v483_v32 = vld [vmem:[%s2179_s9 + $0xd0] sm:$0xff] }
  0xce   : > { %720 = vst [vmem:[%s2803_s28 + $0x28] sm:$0xff] %v2831_v54  ;;  %v606_v44 = vmul.f32 %v2241_v25, %v2344_v48  ;;  %v2919_v45 = vadd.f32 %v603_v12, %v538_v14  ;;  %v542_v47 = vmul.f32 %v2231_v19, %v477_v33  ;;  %v607_v50 = vmul.f32 %v2241_v25, %v2352_v55  ;;  %v484_v12 = vld [vmem:[%s2179_s9 + $0xd8] sm:$0xff] }
  0xcf   : > { %721 = vst [vmem:[%s2803_s28 + $0x30] sm:$0xff] %v2839_v9  ;;  %v2927_v52 = vadd.f32 %v604_v13, %v539_v28  ;;  %v543_v48 = vmul.f32 %v2231_v19, %v478_v39  ;;  %v608_v57 = vmul.f32 %v2241_v25, %v2369_v11  ;;  %v2935_v3 = vadd.f32 %v605_v18, %v540_v34  ;;  %v485_v13 = vld [vmem:[%s2179_s9 + $0xe0] sm:$0xff]  ;;  %v486_v18 = vld [vmem:[%s2179_s9 + $0xe8] sm:$0xff] }
  0xd0   : > { %722 = vst [vmem:[%s2803_s28 + $0x38] sm:$0xff] %v2847_v0  ;;  %v544_v55 = vmul.f32 %v2231_v19, %v479_v43  ;;  %v609_v63 = vmul.f32 %v2241_v25, %v2378_v22  ;;  %v2943_v20 = vadd.f32 %v606_v44, %v541_v40  ;;  %v545_v11 = vmul.f32 %v2231_v19, %v480_v23  ;;  %v487_v44 = vld [vmem:[%s2179_s9 + $0xf0] sm:$0xff] }
  0xd1   : > { %723 = vst [vmem:[%s2803_s28 + $0x40] sm:$0xff] %v2855_v24  ;;  %v610_v5 = vmul.f32 %v2241_v25, %v2386_v30  ;;  %v2951_v21 = vadd.f32 %v607_v50, %v542_v47  ;;  %v546_v22 = vmul.f32 %v2231_v19, %v481_v56  ;;  %v611_v14 = vmul.f32 %v2241_v25, %v2395_v37  ;;  %v488_v50 = vld [vmem:[%s2179_s9 + $0xf8] sm:$0xff] }
  0xd2   : > { %724 = vst [vmem:[%s2803_s28 + $0x48] sm:$0xff] %v2863_v17  ;;  %v2959_v6 = vadd.f32 %v608_v57, %v543_v48  ;;  %v547_v30 = vmul.f32 %v2231_v19, %v482_v61  ;;  %v612_v28 = vmul.f32 %v2241_v25, %v2398_v38  ;;  %v2967_v33 = vadd.f32 %v609_v63, %v544_v55  ;;  %v489_v57 = vld [vmem:[%s2179_s9 + $0x100] sm:$0xff]  ;;  %v490_v63 = vld [vmem:[%s2179_s9 + $0x108] sm:$0xff] }
  0xd3   : > { %725 = vst [vmem:[%s2803_s28 + $0x50] sm:$0xff] %v2871_v31  ;;  %v548_v37 = vmul.f32 %v2231_v19, %v483_v32  ;;  %v613_v34 = vmul.f32 %v2241_v25, %v2406_v46  ;;  %v2975_v39 = vadd.f32 %v610_v5, %v545_v11  ;;  %v549_v38 = vmul.f32 %v2231_v19, %v484_v12  ;;  %v491_v5 = vld [vmem:[%s2179_s9 + $0x110] sm:$0xff] }
  0xd4   : > { %726 = vst [vmem:[%s2803_s28 + $0x58] sm:$0xff] %v2879_v59  ;;  %v614_v40 = vmul.f32 %v2241_v25, %v2423_v62  ;;  %v2983_v43 = vadd.f32 %v611_v14, %v546_v22  ;;  %v550_v46 = vmul.f32 %v2231_v19, %v485_v13  ;;  %v615_v47 = vmul.f32 %v2241_v25, %v2432_v16  ;;  %v492_v14 = vld [vmem:[%s2179_s9 + $0x118] sm:$0xff] }
  0xd5   : > { %727 = vst [vmem:[%s2803_s28 + $0x60] sm:$0xff] %v2887_v60  ;;  %v2991_v23 = vadd.f32 %v612_v28, %v547_v30  ;;  %v551_v62 = vmul.f32 %v2231_v19, %v486_v18  ;;  %v616_v48 = vmul.f32 %v2241_v25, %v2440_v26  ;;  %v2999_v56 = vadd.f32 %v613_v34, %v548_v37  ;;  %v493_v28 = vld [vmem:[%s2179_s9 + $0x120] sm:$0xff]  ;;  %v494_v18 = vld [vmem:[%s2179_s9 + $0x128] sm:$0xff] }
  0xd6   : > { %728 = vst [vmem:[%s2803_s28 + $0x68] sm:$0xff] %v2895_v53  ;;  %v552_v16 = vmul.f32 %v2231_v19, %v487_v44  ;;  %v617_v55 = vmul.f32 %v2241_v25, %v2449_v35  ;;  %v3007_v61 = vadd.f32 %v614_v40, %v549_v38  ;;  %v553_v26 = vmul.f32 %v2231_v19, %v488_v50  ;;  %v3699_v37 = vld [vmem:[#allocation24_spill] sm:$0xff]  ;;  %v3700_v40 = vld [vmem:[#allocation25_spill] sm:$0xff] }
  0xd7   : > { %729 = vst [vmem:[%s2803_s28 + $0x70] sm:$0xff] %v2903_v58  ;;  %v618_v11 = vmul.f32 %v2241_v25, %v2452_v36  ;;  %v3015_v32 = vadd.f32 %v615_v47, %v550_v46  ;;  %v554_v35 = vmul.f32 %v2231_v19, %v489_v57  ;;  %v619_v22 = vmul.f32 %v2241_v25, %v2460_v49  ;;  %v495_v46 = vld [vmem:[%s2179_s9 + $0x130] sm:$0xff]  ;;  %v496_v57 = vld [vmem:[%s2179_s9 + $0x138] sm:$0xff] }
  0xd8   : > { %730 = vst [vmem:[%s2803_s28 + $0x78] sm:$0xff] %v2911_v27  ;;  %v3023_v12 = vadd.f32 %v616_v48, %v551_v62  ;;  %v555_v36 = vmul.f32 %v2231_v19, %v490_v63  ;;  %v620_v30 = vmul.f32 %v2241_v25, %v2477_v8  ;;  %v3031_v13 = vadd.f32 %v617_v55, %v552_v16  ;;  %v3701_v62 = vld [vmem:[#allocation26_spill] sm:$0xff]  ;;  %v3702_v63 = vld [vmem:[#allocation27_spill] sm:$0xff] }
  0xd9   : > { %731 = vst [vmem:[%s2803_s28 + $0x80] sm:$0xff] %v2919_v45  ;;  %v556_v49 = vmul.f32 %v2231_v19, %v491_v5  ;;  %v621_v34 = vmul.f32 %v2241_v25, %v3699_v37  ;;  %v3039_v38 = vadd.f32 %v618_v11, %v553_v26  ;;  %v557_v8 = vmul.f32 %v2231_v19, %v492_v14  ;;  %v497_v11 = vld [vmem:[%s2179_s9 + $0x140] sm:$0xff]  ;;  %v3705_v37 = vld [vmem:[#allocation29_spill] sm:$0xff] }
  0xda   : > { %732 = vst [vmem:[%s2803_s28 + $0x88] sm:$0xff] %v2927_v52  ;;  %v622_v44 = vmul.f32 %v2241_v25, %v3700_v40  ;;  %v3047_v47 = vadd.f32 %v619_v22, %v554_v35  ;;  %v558_v50 = vmul.f32 %v2231_v19, %v493_v28  ;;  %v623_v48 = vmul.f32 %v2241_v25, %v3701_v62  ;;  %v3703_v22 = vld [vmem:[#allocation28_spill] sm:$0xff] }
  0xdb   : > { %733 = vst [vmem:[%s2803_s28 + $0x90] sm:$0xff] %v2935_v3  ;;  %v3055_v16 = vadd.f32 %v620_v30, %v555_v36  ;;  %v559_v55 = vmul.f32 %v2231_v19, %v494_v18  ;;  %v624_v26 = vmul.f32 %v2241_v25, %v3702_v63  ;;  %v3063_v5 = vadd.f32 %v621_v34, %v556_v49  ;;  %v498_v36 = vld [vmem:[%s2179_s9 + $0x148] sm:$0xff]  ;;  %v499_v49 = vld [vmem:[%s2179_s9 + $0x150] sm:$0xff]  ;;  %v3709_v63 = vld [vmem:[#allocation31_spill] sm:$0xff] }
  0xdc   : > { %734 = vst [vmem:[%s2803_s28 + $0x98] sm:$0xff] %v2943_v20  ;;  %v560_v35 = vmul.f32 %v2231_v19, %v495_v46  ;;  %v625_v14 = vmul.f32 %v2241_v25, %v3703_v22  ;;  %v3071_v30 = vadd.f32 %v622_v44, %v557_v8  ;;  %v561_v28 = vmul.f32 %v2231_v19, %v496_v57  ;;  %v3707_v46 = vld [vmem:[#allocation30_spill] sm:$0xff]  ;;  %v500_v8 = vld [vmem:[%s2179_s9 + $0x158] sm:$0xff] }
  0xdd   : > { %735 = vst [vmem:[%s2803_s28 + $0xa0] sm:$0xff] %v2951_v21  ;;  %v626_v18 = vmul.f32 %v2241_v25, %v3705_v37  ;;  %v3079_v34 = vadd.f32 %v623_v48, %v558_v50  ;;  %v562_v40 = vmul.f32 %v2231_v19, %v497_v11  ;;  %v627_v62 = vmul.f32 %v2241_v25, %v3707_v46  ;;  %v501_v50 = vld [vmem:[%s2179_s9 + $0x160] sm:$0xff] }
  0xde   : > { %736 = vst [vmem:[%s2803_s28 + $0xa8] sm:$0xff] %v2959_v6  ;;  %v3087_v44 = vadd.f32 %v624_v26, %v559_v55  ;;  %v563_v57 = vmul.f32 %v2231_v19, %v498_v36  ;;  %v628_v22 = vmul.f32 %v2241_v25, %v3709_v63  ;;  %v3095_v48 = vadd.f32 %v625_v14, %v560_v35  ;;  %v3711_v37 = vld [vmem:[#allocation32_spill] sm:$0xff]  ;;  %v502_v55 = vld [vmem:[%s2179_s9 + $0x168] sm:$0xff]  ;;  %v503_v35 = vld [vmem:[%s2179_s9 + $0x170] sm:$0xff] }
  0xdf   : > { %737 = vst [vmem:[%s2803_s28 + $0xb0] sm:$0xff] %v2967_v33  ;;  %v564_v11 = vmul.f32 %v2231_v19, %v499_v49  ;;  %v629_v46 = vmul.f32 %v2241_v25, %v3711_v37  ;;  %v3103_v26 = vadd.f32 %v626_v18, %v561_v28  ;;  %v565_v36 = vmul.f32 %v2231_v19, %v500_v8  ;;  %v3713_v63 = vld [vmem:[#allocation33_spill] sm:$0xff]  ;;  %v3715_v37 = vld [vmem:[#allocation34_spill] sm:$0xff]  ;;  %v504_v28 = vld [vmem:[%s2179_s9 + $0x178] sm:$0xff] }
  0xe0   : > { %738 = vst [vmem:[%s2803_s28 + $0xb8] sm:$0xff] %v2975_v39  ;;  %v3111_v14 = vadd.f32 %v627_v62, %v562_v40  ;;  %v566_v49 = vmul.f32 %v2231_v19, %v501_v50  ;;  %v3119_v18 = vadd.f32 %v628_v22, %v563_v57  ;;  %v567_v8 = vmul.f32 %v2231_v19, %v502_v55  ;;  %v505_v40 = vld [vmem:[%s2179_s9 + $0x180] sm:$0xff]  ;;  %v506_v57 = vld [vmem:[%s2179_s9 + $0x188] sm:$0xff] }
  0xe1   : > { %739 = vst [vmem:[%s2803_s28 + $0xc0] sm:$0xff] %v2983_v43  ;;  %v3127_v62 = vadd.f32 %v629_v46, %v564_v11  ;;  %v568_v50 = vmul.f32 %v2231_v19, %v503_v35  ;;  %v569_v55 = vmul.f32 %v2231_v19, %v504_v28  ;;  %v507_v11 = vld [vmem:[%s2179_s9 + $0x190] sm:$0xff]  ;;  %v570_v35 = vmul.f32 %v2231_v19, %v505_v40 }
  0xe2   : > { %740 = vst [vmem:[%s2803_s28 + $0xc8] sm:$0xff] %v2991_v23  ;;  %v571_v28 = vmul.f32 %v2231_v19, %v506_v57  ;;  %v572_v40 = vmul.f32 %v2231_v19, %v507_v11 }
  0xe3   : > { %741 = vst [vmem:[%s2803_s28 + $0xd0] sm:$0xff] %v2999_v56 }
  0xe4   : > { %742 = vst [vmem:[%s2803_s28 + $0xd8] sm:$0xff] %v3007_v61 }
  0xe5   : > { %743 = vst [vmem:[%s2803_s28 + $0xe0] sm:$0xff] %v3015_v32 }
  0xe6   : > { %744 = vst [vmem:[%s2803_s28 + $0xe8] sm:$0xff] %v3023_v12 }
  0xe7   : > { %745 = vst [vmem:[%s2803_s28 + $0xf0] sm:$0xff] %v3031_v13 }
  0xe8   : > { %746 = vst [vmem:[%s2803_s28 + $0xf8] sm:$0xff] %v3039_v38 }
  0xe9   : > { %747 = vst [vmem:[%s2803_s28 + $0x100] sm:$0xff] %v3047_v47 }
  0xea   : > { %748 = vst [vmem:[%s2803_s28 + $0x108] sm:$0xff] %v3055_v16 }
  0xeb   : > { %3704 = vst [vmem:[#allocation24_spill] sm:$0xff] %v3071_v30 }
  0xec   : > { %749 = vst [vmem:[%s2803_s28 + $0x110] sm:$0xff] %v3063_v5 }
  0xed   : > { %3706 = vst [vmem:[#allocation25_spill] sm:$0xff] %v3079_v34 }
  0xee   : > { %750 = vst [vmem:[%s2803_s28 + $0x118] sm:$0xff] %v3071_v30  ;;  %v630_v30 = vmul.f32 %v2241_v25, %v3713_v63  ;;  %v3717_v63 = vld [vmem:[#allocation35_spill] sm:$0xff] }
  0xef   : > { %3708 = vst [vmem:[#allocation26_spill] sm:$0xff] %v3087_v44 }
  0xf0   : > { %751 = vst [vmem:[%s2803_s28 + $0x120] sm:$0xff] %v3079_v34  ;;  %v631_v34 = vmul.f32 %v2241_v25, %v3715_v37  ;;  %v3719_v37 = vld [vmem:[#allocation36_spill] sm:$0xff]  ;;  %v3135_v22 = vadd.f32 %v630_v30, %v565_v36  ;;  %v508_v30 = vld [vmem:[%s2179_s9 + $0x198] sm:$0xff] }
  0xf1   : > { %3710 = vst [vmem:[#allocation27_spill] sm:$0xff] %v3095_v48  ;;  %v573_v57 = vmul.f32 %v2231_v19, %v508_v30 }
  0xf2   : > { %752 = vst [vmem:[%s2803_s28 + $0x128] sm:$0xff] %v3087_v44  ;;  %v632_v44 = vmul.f32 %v2241_v25, %v3717_v63  ;;  %v3721_v63 = vld [vmem:[#allocation37_spill] sm:$0xff]  ;;  %v3143_v46 = vadd.f32 %v631_v34, %v566_v49  ;;  %v509_v34 = vld [vmem:[%s2179_s9 + $0x1a0] sm:$0xff] }
  0xf3   : > { %3712 = vst [vmem:[#allocation28_spill] sm:$0xff] %v3103_v26  ;;  %v574_v11 = vmul.f32 %v2231_v19, %v509_v34  ;;  %v3732_v34 = vld [vmem:[#allocation43_spill] sm:$0xff] }
  0xf4   : > { %753 = vst [vmem:[%s2803_s28 + $0x130] sm:$0xff] %v3095_v48  ;;  %v633_v48 = vmul.f32 %v2241_v25, %v3719_v37  ;;  %v3722_v37 = vld [vmem:[#allocation38_spill] sm:$0xff]  ;;  %v3151_v36 = vadd.f32 %v632_v44, %v567_v8  ;;  %v510_v44 = vld [vmem:[%s2179_s9 + $0x1a8] sm:$0xff] }
  0xf5   : > { %3714 = vst [vmem:[#allocation29_spill] sm:$0xff] %v3111_v14  ;;  %v575_v30 = vmul.f32 %v2231_v19, %v510_v44 }
  0xf6   : > { %754 = vst [vmem:[%s2803_s28 + $0x138] sm:$0xff] %v3103_v26  ;;  %v634_v26 = vmul.f32 %v2241_v25, %v3721_v63  ;;  %v3724_v63 = vld [vmem:[#allocation39_spill] sm:$0xff]  ;;  %v3159_v49 = vadd.f32 %v633_v48, %v568_v50  ;;  %v511_v48 = vld [vmem:[%s2179_s9 + $0x1b0] sm:$0xff] }
  0xf7   : > { %3716 = vst [vmem:[#allocation30_spill] sm:$0xff] %v3119_v18 }
  0xf8   : > { %755 = vst [vmem:[%s2803_s28 + $0x140] sm:$0xff] %v3111_v14  ;;  %v635_v14 = vmul.f32 %v2241_v25, %v3722_v37  ;;  %v3726_v37 = vld [vmem:[#allocation40_spill] sm:$0xff]  ;;  %v3167_v8 = vadd.f32 %v634_v26, %v569_v55  ;;  %v512_v26 = vld [vmem:[%s2179_s9 + $0x1b8] sm:$0xff] }
  0xf9   : > { %3718 = vst [vmem:[#allocation31_spill] sm:$0xff] %v3127_v62  ;;  %v577_v44 = vmul.f32 %v2231_v19, %v512_v26 }
  0xfa   : > { %756 = vst [vmem:[%s2803_s28 + $0x148] sm:$0xff] %v3119_v18  ;;  %v636_v18 = vmul.f32 %v2241_v25, %v3724_v63  ;;  %v3728_v63 = vld [vmem:[#allocation41_spill] sm:$0xff]  ;;  %v3175_v50 = vadd.f32 %v635_v14, %v570_v35  ;;  %v513_v14 = vld [vmem:[%s2179_s9 + $0x1c0] sm:$0xff] }
  0xfb   : > { %3720 = vst [vmem:[#allocation32_spill] sm:$0xff] %v3135_v22 }
  0xfc   : > { %757 = vst [vmem:[%s2803_s28 + $0x150] sm:$0xff] %v3127_v62  ;;  %v637_v62 = vmul.f32 %v2241_v25, %v3726_v37  ;;  %v639_v37 = vmul.f32 %v2241_v25, %v2648_v10  ;;  %v3183_v55 = vadd.f32 %v636_v18, %v571_v28  ;;  %v576_v10 = vmul.f32 %v2231_v19, %v511_v48  ;;  %v514_v18 = vld [vmem:[%s2179_s9 + $0x1c8] sm:$0xff] }
  0xfd   : > { %758 = vst [vmem:[%s2803_s28 + $0x158] sm:$0xff] %v3135_v22  ;;  %v638_v22 = vmul.f32 %v2241_v25, %v3728_v63  ;;  %v3731_v63 = vld [vmem:[#allocation42_spill] sm:$0xff]  ;;  %v578_v48 = vmul.f32 %v2231_v19, %v513_v14  ;;  %v579_v26 = vmul.f32 %v2231_v19, %v514_v18 }
  0xfe   : > { %3723 = vst [vmem:[#allocation33_spill] sm:$0xff] %v3151_v36  ;;  %v3191_v35 = vadd.f32 %v637_v62, %v572_v40  ;;  %v515_v62 = vld [vmem:[%s2179_s9 + $0x1d0] sm:$0xff]  ;;  %v3207_v40 = vadd.f32 %v639_v37, %v574_v11  ;;  %v517_v11 = vld [vmem:[%s2179_s9 + $0x1e0] sm:$0xff] }
  0xff   : > { %759 = vst [vmem:[%s2803_s28 + $0x160] sm:$0xff] %v3143_v46  ;;  %v3199_v28 = vadd.f32 %v638_v22, %v573_v57  ;;  %v516_v22 = vld [vmem:[%s2179_s9 + $0x1d8] sm:$0xff]  ;;  %v580_v14 = vmul.f32 %v2231_v19, %v515_v62  ;;  %v3737_v62 = vld [vmem:[#allocation49_spill] sm:$0xff] }
 0x100   : > { %3725 = vst [vmem:[#allocation34_spill] sm:$0xff] %v3159_v49  ;;  %v581_v18 = vmul.f32 %v2231_v19, %v516_v22 }
 0x101   : > { %760 = vst [vmem:[%s2803_s28 + $0x168] sm:$0xff] %v3151_v36  ;;  %v640_v36 = vmul.f32 %v2241_v25, %v3731_v63  ;;  %v3733_v63 = vld [vmem:[#allocation44_spill] sm:$0xff] }
 0x102   : > { %3727 = vst [vmem:[#allocation35_spill] sm:$0xff] %v3167_v8 }
 0x103   : > { %761 = vst [vmem:[%s2803_s28 + $0x170] sm:$0xff] %v3159_v49  ;;  %v641_v49 = vmul.f32 %v2241_v25, %v3732_v34  ;;  %v3735_v34 = vld [vmem:[#allocation45_spill] sm:$0xff]  ;;  %v3215_v57 = vadd.f32 %v640_v36, %v575_v30 }
 0x104   : > { %3729 = vst [vmem:[#allocation36_spill] sm:$0xff] %v3175_v50  ;;  %v518_v36 = vld [vmem:[%s2179_s9 + $0x1e8] sm:$0xff] }
 0x105   : > { %762 = vst [vmem:[%s2803_s28 + $0x178] sm:$0xff] %v3167_v8  ;;  %v642_v8 = vmul.f32 %v2241_v25, %v3733_v63  ;;  %v3736_v63 = vld [vmem:[#allocation46_spill] sm:$0xff]  ;;  %v3223_v37 = vadd.f32 %v641_v49, %v576_v10  ;;  %v582_v10 = vmul.f32 %v2231_v19, %v517_v11  ;;  %v583_v22 = vmul.f32 %v2231_v19, %v518_v36 }
 0x106   : > { %3730 = vst [vmem:[#allocation37_spill] sm:$0xff] %v3183_v55  ;;  %v650_v36 = vmul.f32 %v2241_v25, %v2745_v29 }
 0x107   : > { %763 = vst [vmem:[%s2803_s28 + $0x180] sm:$0xff] %v3175_v50  ;;  %v643_v50 = vmul.f32 %v2241_v25, %v3735_v34  ;;  %v645_v34 = vmul.f32 %v2241_v25, %v2701_v15  ;;  %v3231_v30 = vadd.f32 %v642_v8, %v577_v44  ;;  %v647_v15 = vmul.f32 %v2241_v25, %v3737_v62  ;;  %v520_v8 = vld [vmem:[%s2179_s9 + $0x1f8] sm:$0xff] }
 0x108   : > { %764 = vst [vmem:[%s2803_s28 + $0x188] sm:$0xff] %v3183_v55  ;;  %v644_v55 = vmul.f32 %v2241_v25, %v3736_v63  ;;  %v646_v63 = vmul.f32 %v2241_v25, %v2708_v42  ;;  %v3738_v42 = vld [vmem:[#allocation50_spill] sm:$0xff]  ;;  %v649_v62 = vmul.f32 %v2241_v25, %v2729_v51 }
 0x109   : > { %765 = vst [vmem:[%s2803_s28 + $0x190] sm:$0xff] %v3191_v35  ;;  %v3239_v49 = vadd.f32 %v643_v50, %v578_v48  ;;  %v648_v50 = vmul.f32 %v2241_v25, %v3738_v42  ;;  %v3254_v48 = vadd.f32 %v645_v34, %v580_v14 }
 0x10a   : > { %3734 = vst [vmem:[#allocation38_spill] sm:$0xff] %v3207_v40  ;;  %v3247_v44 = vadd.f32 %v644_v55, %v579_v26  ;;  %v3261_v55 = vadd.f32 %v646_v63, %v581_v18  ;;  %v585_v26 = vmul.f32 %v2231_v19, %v520_v8 }
 0x10b   : > { %766 = vst [vmem:[%s2803_s28 + $0x198] sm:$0xff] %v3199_v28  ;;  %v3272_v14 = vadd.f32 %v648_v50, %v583_v22 }
 0x10c   : > { %767 = vst [vmem:[%s2803_s28 + $0x1a0] sm:$0xff] %v3207_v40  ;;  %v519_v40 = vld [vmem:[%s2179_s9 + $0x1f0] sm:$0xff]  ;;  %v3282_v25 = vadd.f32 %v650_v36, %v585_v26  ;;  %v1669_v26 = vld [vmem:[%s2169_s30 + $0x38] sm:$0xff]  ;;  %s3498_s9 = sshll.u32 %s1313_s14, 4  ;;  %s1317_s9 = int_to_ptr.hbm [resolvable:$true] %s3498_s9 }
 0x10d   : > { %768 = vst [vmem:[%s2803_s28 + $0x1a8] sm:$0xff] %v3215_v57  ;;  %v584_v11 = vmul.f32 %v2231_v19, %v519_v40  ;;  %v3268_v40 = vadd.f32 %v647_v15, %v582_v10  ;;  %v1662_v19 = vld [vmem:[%s2169_s30] sm:$0xff]  ;;  %v1663_v15 = vld [vmem:[%s2169_s30 + $0x8] sm:$0xff]  ;;  %v1664_v10 = vld [vmem:[%s2169_s30 + $0x10] sm:$0xff]  ;;  %v1170_v36 = vsub.f32 %v1669_v26, %v2847_v0 }
 0x10e   : > { %769 = vst [vmem:[%s2803_s28 + $0x1b0] sm:$0xff] %v3223_v37  ;;  %v1163_v34 = vsub.f32 %v1662_v19, %v2789_v1  ;;  %v1164_v18 = vsub.f32 %v1663_v15, %v2796_v2  ;;  %v1165_v8 = vsub.f32 %v1664_v10, %v2807_v4  ;;  %v1666_v2 = vld [vmem:[%s2169_s30 + $0x20] sm:$0xff]  ;;  %v1667_v4 = vld [vmem:[%s2169_s30 + $0x28] sm:$0xff]  ;;  %v1673_v0 = vld [vmem:[%s2169_s30 + $0x58] sm:$0xff] }
 0x10f   : > { %770 = vst [vmem:[%s2803_s28 + $0x1b8] sm:$0xff] %v3231_v30  ;;  %v3276_v63 = vadd.f32 %v649_v62, %v584_v11  ;;  %v1665_v62 = vld [vmem:[%s2169_s30 + $0x18] sm:$0xff]  ;;  %v1167_v22 = vsub.f32 %v1666_v2, %v2823_v41  ;;  %v1168_v50 = vsub.f32 %v1667_v4, %v2831_v54  ;;  %v1670_v41 = vld [vmem:[%s2169_s30 + $0x40] sm:$0xff]  ;;  %v1671_v54 = vld [vmem:[%s2169_s30 + $0x48] sm:$0xff] }
 0x110   : > { %771 = vst [vmem:[%s2803_s28 + $0x1c0] sm:$0xff] %v3239_v49  ;;  %v1166_v1 = vsub.f32 %v1665_v62, %v2815_v7  ;;  %v1668_v7 = vld [vmem:[%s2169_s30 + $0x30] sm:$0xff]  ;;  %v1171_v19 = vsub.f32 %v1670_v41, %v2855_v24  ;;  %v1674_v24 = vld [vmem:[%s2169_s30 + $0x60] sm:$0xff] }
 0x111   : > { %772 = vst [vmem:[%s2803_s28 + $0x1c8] sm:$0xff] %v3247_v44  ;;  %v1169_v11 = vsub.f32 %v1668_v7, %v2839_v9  ;;  %v1672_v9 = vld [vmem:[%s2169_s30 + $0x50] sm:$0xff]  ;;  %v1175_v10 = vsub.f32 %v1674_v24, %v2887_v60  ;;  %v1678_v60 = vld [vmem:[%s2169_s30 + $0x80] sm:$0xff] }
 0x112   : > { %773 = vst [vmem:[%s2803_s28 + $0x1d0] sm:$0xff] %v3254_v48  ;;  %v1173_v15 = vsub.f32 %v1672_v9, %v2871_v31  ;;  %v1676_v31 = vld [vmem:[%s2169_s30 + $0x70] sm:$0xff]  ;;  %v1179_v2 = vsub.f32 %v1678_v60, %v2919_v45  ;;  %v1682_v45 = vld [vmem:[%s2169_s30 + $0xa0] sm:$0xff] }
 0x113   : > { %774 = vst [vmem:[%s2803_s28 + $0x1d8] sm:$0xff] %v3261_v55  ;;  %v1177_v62 = vsub.f32 %v1676_v31, %v2903_v58  ;;  %v1680_v58 = vld [vmem:[%s2169_s30 + $0x90] sm:$0xff]  ;;  %v1183_v7 = vsub.f32 %v1682_v45, %v2951_v21  ;;  %v1686_v21 = vld [vmem:[%s2169_s30 + $0xc0] sm:$0xff] }
 0x114   : > { %775 = vst [vmem:[%s2803_s28 + $0x1e0] sm:$0xff] %v3268_v40  ;;  %v1181_v4 = vsub.f32 %v1680_v58, %v2935_v3  ;;  %v1684_v3 = vld [vmem:[%s2169_s30 + $0xb0] sm:$0xff]  ;;  %v1187_v41 = vsub.f32 %v1686_v21, %v2983_v43  ;;  %v1690_v43 = vld [vmem:[%s2169_s30 + $0xe0] sm:$0xff] }
 0x115   : > { %776 = vst [vmem:[%s2803_s28 + $0x1e8] sm:$0xff] %v3272_v14  ;;  %v1185_v26 = vsub.f32 %v1684_v3, %v2967_v33  ;;  %v1688_v33 = vld [vmem:[%s2169_s30 + $0xd0] sm:$0xff]  ;;  %v1191_v9 = vsub.f32 %v1690_v43, %v3015_v32  ;;  %v1694_v32 = vld [vmem:[%s2169_s30 + $0x100] sm:$0xff] }
 0x116   : > { %777 = vst [vmem:[%s2803_s28 + $0x1f0] sm:$0xff] %v3276_v63  ;;  %v1195_v24 = vsub.f32 %v1694_v32, %v3047_v47  ;;  %v1698_v47 = vld [vmem:[%s2169_s30 + $0x120] sm:$0xff]  ;;  %v1704_v3 = vld [vmem:[%s2169_s30 + $0x150] sm:$0xff]  ;;  %v3752_v32 = vld [vmem:[#allocation37_spill] sm:$0xff] }
 0x117   : > { %778 = vst [vmem:[%s2803_s28 + $0x1f8] sm:$0xff] %v3282_v25  ;;  %v3743_v58 = vld [vmem:[#allocation28_spill] sm:$0xff]  ;;  %v3749_v43 = vld [vmem:[#allocation34_spill] sm:$0xff]  ;;  %s1840_s28 = scalar_lea.hbm %s1839_s17, 512 }
 0x118   : > { %1227 = vst [vmem:[%s3295_s7] sm:$0xff] %v1163_v34  ;;  %v1172_v34 = vsub.f32 %v1671_v54, %v2863_v17  ;;  %v1675_v17 = vld [vmem:[%s2169_s30 + $0x68] sm:$0xff]  ;;  %v1189_v54 = vsub.f32 %v1688_v33, %v2999_v56  ;;  %v1692_v56 = vld [vmem:[%s2169_s30 + $0xf0] sm:$0xff]  ;;  %v3747_v21 = vld [vmem:[#allocation32_spill] sm:$0xff]  ;;  %p1841_p6 = scmp.ne.s32.totalorder %s1839_s17, %s1840_s28  ;;  %p1846_p1 = scmp.lt.s32.totalorder %s1844_s19, %s1840_s28 }
 0x119   : > { %1228 = vst [vmem:[%s3295_s7 + $0x8] sm:$0xff] %v1164_v18  ;;  %v1174_v18 = vsub.f32 %v1673_v0, %v2879_v59  ;;  %v1677_v59 = vld [vmem:[%s2169_s30 + $0x78] sm:$0xff]  ;;  %v1193_v0 = vsub.f32 %v1692_v56, %v3031_v13  ;;  %v1696_v13 = vld [vmem:[%s2169_s30 + $0x110] sm:$0xff]  ;;  %v1707_v33 = vld [vmem:[%s2169_s30 + $0x168] sm:$0xff] }
 0x11a   : > { %1229 = vst [vmem:[%s3295_s7 + $0x10] sm:$0xff] %v1165_v8  ;;  %v1176_v8 = vsub.f32 %v1675_v17, %v2895_v53  ;;  %v1679_v53 = vld [vmem:[%s2169_s30 + $0x88] sm:$0xff]  ;;  %v1197_v17 = vsub.f32 %v1696_v13, %v3063_v5  ;;  %v1700_v5 = vld [vmem:[%s2169_s30 + $0x130] sm:$0xff]  ;;  %v1713_v13 = vld [vmem:[%s2169_s30 + $0x198] sm:$0xff]  ;;  %p1842_p8 = pnand %p1841_p6, %p2094_p11  ;;  %p1847_p5 = por %p1846_p1, %p1845_p9 }
 0x11b   : > { %1230 = vst [vmem:[%s3295_s7 + $0x18] sm:$0xff] %v1166_v1  ;;  %v1178_v1 = vsub.f32 %v1677_v59, %v2911_v27  ;;  %v1681_v27 = vld [vmem:[%s2169_s30 + $0x98] sm:$0xff] }
 0x11c   : > { %1231 = vst [vmem:[%s3295_s7 + $0x20] sm:$0xff] %v1167_v22  ;;  %v1180_v22 = vsub.f32 %v1679_v53, %v2927_v52  ;;  %v1683_v52 = vld [vmem:[%s2169_s30 + $0xa8] sm:$0xff]  ;;  %p1843_p4 = pneg %p1842_p8 }
 0x11d   : > { %1232 = vst [vmem:[%s3295_s7 + $0x28] sm:$0xff] %v1168_v50  ;;  %v1182_v50 = vsub.f32 %v1681_v27, %v2943_v20  ;;  %v1685_v20 = vld [vmem:[%s2169_s30 + $0xb8] sm:$0xff]  ;;  %v1702_v27 = vld [vmem:[%s2169_s30 + $0x140] sm:$0xff] }
 0x11e   : > { %1233 = vst [vmem:[%s3295_s7 + $0x30] sm:$0xff] %v1169_v11  ;;  %v1184_v11 = vsub.f32 %v1683_v52, %v2959_v6  ;;  %v1687_v6 = vld [vmem:[%s2169_s30 + $0xc8] sm:$0xff]  ;;  %v3745_v52 = vld [vmem:[#allocation30_spill] sm:$0xff]  ;;  %p1848_p3 = pnand %p1847_p5, %p1843_p4 }
 0x11f   : > { %1234 = vst [vmem:[%s3295_s7 + $0x38] sm:$0xff] %v1170_v36  ;;  %v1186_v36 = vsub.f32 %v1685_v20, %v2975_v39  ;;  %v1689_v39 = vld [vmem:[%s2169_s30 + $0xd8] sm:$0xff] }
 0x120   : > { %1235 = vst [vmem:[%s3295_s7 + $0x40] sm:$0xff] %v1171_v19  ;;  %v1188_v19 = vsub.f32 %v1687_v6, %v2991_v23  ;;  %v1691_v23 = vld [vmem:[%s2169_s30 + $0xe8] sm:$0xff]  ;;  %v1706_v6 = vld [vmem:[%s2169_s30 + $0x160] sm:$0xff] }
 0x121   : > { %1236 = vst [vmem:[%s3295_s7 + $0x48] sm:$0xff] %v1172_v34  ;;  %v1190_v34 = vsub.f32 %v1689_v39, %v3007_v61  ;;  %v1693_v61 = vld [vmem:[%s2169_s30 + $0xf8] sm:$0xff] }
 0x122   : > { %1237 = vst [vmem:[%s3295_s7 + $0x50] sm:$0xff] %v1173_v15  ;;  %v1192_v15 = vsub.f32 %v1691_v23, %v3023_v12  ;;  %v1695_v12 = vld [vmem:[%s2169_s30 + $0x108] sm:$0xff]  ;;  %v1709_v23 = vld [vmem:[%s2169_s30 + $0x178] sm:$0xff] }
 0x123   : > { %1238 = vst [vmem:[%s3295_s7 + $0x58] sm:$0xff] %v1174_v18  ;;  %v1194_v18 = vsub.f32 %v1693_v61, %v3039_v38  ;;  %v1697_v38 = vld [vmem:[%s2169_s30 + $0x118] sm:$0xff] }
 0x124   : > { %1239 = vst [vmem:[%s3295_s7 + $0x60] sm:$0xff] %v1175_v10  ;;  %v1196_v10 = vsub.f32 %v1695_v12, %v3055_v16  ;;  %v1699_v16 = vld [vmem:[%s2169_s30 + $0x128] sm:$0xff]  ;;  %v1712_v12 = vld [vmem:[%s2169_s30 + $0x190] sm:$0xff] }
 0x125   : > { %1240 = vst [vmem:[%s3295_s7 + $0x68] sm:$0xff] %v1176_v8  ;;  %v3739_v8 = vld [vmem:[#allocation24_spill] sm:$0xff] }
 0x126   : > { %1241 = vst [vmem:[%s3295_s7 + $0x70] sm:$0xff] %v1177_v62  ;;  %v1198_v31 = vsub.f32 %v1697_v38, %v3739_v8  ;;  %v3740_v62 = vld [vmem:[#allocation25_spill] sm:$0xff]  ;;  %v1714_v38 = vld [vmem:[%s2169_s30 + $0x1a0] sm:$0xff]  ;;  %v3753_v8 = vld [vmem:[#allocation38_spill] sm:$0xff] }
 0x127   : > { %1242 = vst [vmem:[%s3295_s7 + $0x78] sm:$0xff] %v1178_v1  ;;  %v1199_v59 = vsub.f32 %v1698_v47, %v3740_v62  ;;  %v3741_v1 = vld [vmem:[#allocation26_spill] sm:$0xff]  ;;  %v1715_v47 = vld [vmem:[%s2169_s30 + $0x1a8] sm:$0xff] }
 0x128   : > { %1243 = vst [vmem:[%s3295_s7 + $0x80] sm:$0xff] %v1179_v2  ;;  %v1200_v60 = vsub.f32 %v1699_v16, %v3741_v1  ;;  %v3742_v2 = vld [vmem:[#allocation27_spill] sm:$0xff]  ;;  %v1216_v62 = vsub.f32 %v1715_v47, %v3215_v57  ;;  %v1718_v1 = vld [vmem:[%s2169_s30 + $0x1c0] sm:$0xff] }
 0x129   : > { %1244 = vst [vmem:[%s3295_s7 + $0x88] sm:$0xff] %v1180_v22  ;;  %v1201_v53 = vsub.f32 %v1700_v5, %v3742_v2  ;;  %v1701_v22 = vld [vmem:[%s2169_s30 + $0x138] sm:$0xff]  ;;  %v1219_v57 = vsub.f32 %v1718_v1, %v3239_v49  ;;  %v3756_v2 = vld [vmem:[#allocation48_spill] sm:$0xff]  ;;  %v3757_v49 = vld [vmem:[#allocation49_spill] sm:$0xff] }
 0x12a   : > { %1245 = vst [vmem:[%s3295_s7 + $0x90] sm:$0xff] %v1181_v4  ;;  %v1202_v4 = vsub.f32 %v1701_v22, %v3743_v58  ;;  %v3755_v5 = vld [vmem:[#allocation47_spill] sm:$0xff] }
 0x12b   : > { %1246 = vst [vmem:[%s3295_s7 + $0x98] sm:$0xff] %v1182_v50  ;;  %v3744_v50 = vld [vmem:[#allocation29_spill] sm:$0xff] }
 0x12c   : > { %1247 = vst [vmem:[%s3295_s7 + $0xa0] sm:$0xff] %v1183_v7  ;;  %v1203_v45 = vsub.f32 %v1702_v27, %v3744_v50  ;;  %v1703_v7 = vld [vmem:[%s2169_s30 + $0x148] sm:$0xff] }
 0x12d   : > { %1248 = vst [vmem:[%s3295_s7 + $0xa8] sm:$0xff] %v1184_v11  ;;  %v1204_v11 = vsub.f32 %v1703_v7, %v3745_v52 }
 0x12e   : > { %1249 = vst [vmem:[%s3295_s7 + $0xb0] sm:$0xff] %v1185_v26  ;;  %v3746_v26 = vld [vmem:[#allocation31_spill] sm:$0xff] }
 0x12f   : > { %1250 = vst [vmem:[%s3295_s7 + $0xb8] sm:$0xff] %v1186_v36  ;;  %v1205_v20 = vsub.f32 %v1704_v3, %v3746_v26  ;;  %v1705_v36 = vld [vmem:[%s2169_s30 + $0x158] sm:$0xff] }
 0x130   : > { %1251 = vst [vmem:[%s3295_s7 + $0xc0] sm:$0xff] %v1187_v41  ;;  %v1206_v41 = vsub.f32 %v1705_v36, %v3747_v21 }
 0x131   : > { %1252 = vst [vmem:[%s3295_s7 + $0xc8] sm:$0xff] %v1188_v19  ;;  %v1207_v19 = vsub.f32 %v1706_v6, %v3143_v46  ;;  %v1710_v46 = vld [vmem:[%s2169_s30 + $0x180] sm:$0xff] }
 0x132   : > { %1253 = vst [vmem:[%s3295_s7 + $0xd0] sm:$0xff] %v1189_v54  ;;  %v3748_v54 = vld [vmem:[#allocation33_spill] sm:$0xff] }
 0x133   : > { %1254 = vst [vmem:[%s3295_s7 + $0xd8] sm:$0xff] %v1190_v34  ;;  %v1208_v39 = vsub.f32 %v1707_v33, %v3748_v54  ;;  %v1708_v34 = vld [vmem:[%s2169_s30 + $0x170] sm:$0xff] }
 0x134   : > { %1255 = vst [vmem:[%s3295_s7 + $0xe0] sm:$0xff] %v1191_v9  ;;  %v1209_v9 = vsub.f32 %v1708_v34, %v3749_v43 }
 0x135   : > { %1256 = vst [vmem:[%s3295_s7 + $0xe8] sm:$0xff] %v1192_v15  ;;  %v3750_v15 = vld [vmem:[#allocation35_spill] sm:$0xff] }
 0x136   : > { %1257 = vst [vmem:[%s3295_s7 + $0xf0] sm:$0xff] %v1193_v0  ;;  %v1210_v56 = vsub.f32 %v1709_v23, %v3750_v15  ;;  %v3751_v0 = vld [vmem:[#allocation36_spill] sm:$0xff] }
 0x137   : > { %1258 = vst [vmem:[%s3295_s7 + $0xf8] sm:$0xff] %v1194_v18  ;;  %v1211_v61 = vsub.f32 %v1710_v46, %v3751_v0  ;;  %v1711_v18 = vld [vmem:[%s2169_s30 + $0x188] sm:$0xff] }
 0x138   : > { %1259 = vst [vmem:[%s3295_s7 + $0x100] sm:$0xff] %v1195_v24  ;;  %v1212_v24 = vsub.f32 %v1711_v18, %v3752_v32 }
 0x139   : > { %1260 = vst [vmem:[%s3295_s7 + $0x108] sm:$0xff] %v1196_v10  ;;  %v1213_v10 = vsub.f32 %v1712_v12, %v3191_v35  ;;  %v1716_v35 = vld [vmem:[%s2169_s30 + $0x1b0] sm:$0xff] }
 0x13a   : > { %1261 = vst [vmem:[%s3295_s7 + $0x110] sm:$0xff] %v1197_v17  ;;  %v1214_v17 = vsub.f32 %v1713_v13, %v3199_v28  ;;  %v1717_v28 = vld [vmem:[%s2169_s30 + $0x1b8] sm:$0xff]  ;;  %s1347_s30 = scalar_lea.hbm %s3597_s6, %s3448_s20 }
 0x13b   : > { %1262 = vst [vmem:[%s3295_s7 + $0x118] sm:$0xff] %v1198_v31  ;;  %v1215_v31 = vsub.f32 %v1714_v38, %v3753_v8  ;;  %v1218_v16 = vsub.f32 %v1717_v28, %v3231_v30  ;;  %v1221_v30 = vsub.f32 %v3755_v5, %v3254_v48  ;;  %v1224_v48 = vsub.f32 %v3738_v42, %v3272_v14  ;;  %s3501_s26 = sshll.u32 %s1347_s30, 4  ;;  %s1351_s26 = int_to_ptr.hbm [resolvable:$true] %s3501_s26 }
 0x13c   : > { %1263 = vst [vmem:[%s3295_s7 + $0x120] sm:$0xff] %v1199_v59  ;;  %v1217_v59 = vsub.f32 %v1716_v35, %v3223_v37  ;;  %v3754_v37 = vld [vmem:[#allocation46_spill] sm:$0xff] }
 0x13d   : > { %1264 = vst [vmem:[%s3295_s7 + $0x128] sm:$0xff] %v1200_v60  ;;  %v1220_v60 = vsub.f32 %v3754_v37, %v3247_v44  ;;  %v1223_v44 = vsub.f32 %v3757_v49, %v3268_v40  ;;  %v1226_v40 = vsub.f32 %v2745_v29, %v3282_v25 }
 0x13e   : > { %1265 = vst [vmem:[%s3295_s7 + $0x130] sm:$0xff] %v1201_v53  ;;  %v1222_v53 = vsub.f32 %v3756_v2, %v3261_v55  ;;  %v1225_v55 = vsub.f32 %v2729_v51, %v3276_v63 }
 0x13f   : > { %1266 = vst [vmem:[%s3295_s7 + $0x138] sm:$0xff] %v1202_v4 }
 0x140   : > { %1267 = vst [vmem:[%s3295_s7 + $0x140] sm:$0xff] %v1203_v45 }
 0x141   : > { %1268 = vst [vmem:[%s3295_s7 + $0x148] sm:$0xff] %v1204_v11 }
 0x142   : > { %1269 = vst [vmem:[%s3295_s7 + $0x150] sm:$0xff] %v1205_v20 }
 0x143   : > { %1270 = vst [vmem:[%s3295_s7 + $0x158] sm:$0xff] %v1206_v41 }
 0x144   : > { %1271 = vst [vmem:[%s3295_s7 + $0x160] sm:$0xff] %v1207_v19 }
 0x145   : > { %1272 = vst [vmem:[%s3295_s7 + $0x168] sm:$0xff] %v1208_v39 }
 0x146   : > { %1273 = vst [vmem:[%s3295_s7 + $0x170] sm:$0xff] %v1209_v9 }
 0x147   : > { %1274 = vst [vmem:[%s3295_s7 + $0x178] sm:$0xff] %v1210_v56 }
 0x148   : > { %1275 = vst [vmem:[%s3295_s7 + $0x180] sm:$0xff] %v1211_v61 }
 0x149   : > { %1276 = vst [vmem:[%s3295_s7 + $0x188] sm:$0xff] %v1212_v24 }
 0x14a   : > { %1277 = vst [vmem:[%s3295_s7 + $0x190] sm:$0xff] %v1213_v10 }
 0x14b   : > { %1278 = vst [vmem:[%s3295_s7 + $0x198] sm:$0xff] %v1214_v17 }
 0x14c   : > { %1279 = vst [vmem:[%s3295_s7 + $0x1a0] sm:$0xff] %v1215_v31 }
 0x14d   : > { %1280 = vst [vmem:[%s3295_s7 + $0x1a8] sm:$0xff] %v1216_v62 }
 0x14e   : > { %1281 = vst [vmem:[%s3295_s7 + $0x1b0] sm:$0xff] %v1217_v59 }
 0x14f   : > { %1282 = vst [vmem:[%s3295_s7 + $0x1b8] sm:$0xff] %v1218_v16 }
 0x150   : > { %1283 = vst [vmem:[%s3295_s7 + $0x1c0] sm:$0xff] %v1219_v57 }
 0x151   : > { %1284 = vst [vmem:[%s3295_s7 + $0x1c8] sm:$0xff] %v1220_v60 }
 0x152   : > { %1285 = vst [vmem:[%s3295_s7 + $0x1d0] sm:$0xff] %v1221_v30 }
 0x153   : > { %1286 = vst [vmem:[%s3295_s7 + $0x1d8] sm:$0xff] %v1222_v53 }
 0x154   : > { %1287 = vst [vmem:[%s3295_s7 + $0x1e0] sm:$0xff] %v1223_v44 }
 0x155   : > { %1288 = vst [vmem:[%s3295_s7 + $0x1e8] sm:$0xff] %v1224_v48 }
 0x156   : > { %1289 = vst [vmem:[%s3295_s7 + $0x1f0] sm:$0xff] %v1225_v55 }
 0x157   : > { %1290 = vst [vmem:[%s3295_s7 + $0x1f8] sm:$0xff] %v1226_v40 }
 0x158   : > { %1851 = shalt.err (!%p1848_p3)
}
 0x159   : > { %s1963_s12 = smov 128   ;;  %s1964_s8 = smov 8  }
 0x15a   : > { %1592 = dma.vmem_to_hbm [thread:$0]  (%p2094_p11), %s3492_s24, 8192, %s1334_s15, %s3516_s2, %s1963_s12, %s1963_s12, %s1964_s8  }
 0x15b   : > { %s1292_s7 = scalar_lea.sflag [#allocation4], %s2162_s0  ;;  %s1866_s11 = sshra.s32 %s1317_s9, 4  ;;  %s1867_s11 = int_to_ptr.hbm [resolvable:$true] %s1866_s11 }
 0x15c   : > { %s1868_s14 = scalar_lea.hbm %s1867_s11, 512  ;;  %s1872_s30 = scalar_lea.hbm %s3595_s4, 1024 }
 0x15d   : > { %p1869_p7 = scmp.ne.s32.totalorder %s1867_s11, %s1868_s14  ;;  %p1873_p0 = scmp.lt.s32.totalorder %s1867_s11, %s3595_s4 }
 0x15e   : > { %p1874_p2 = scmp.lt.s32.totalorder %s1872_s30, %s1868_s14 }
 0x15f   : > { %p1870_p10 = pnand %p1869_p7, %p2094_p11 }
 0x160   : > { %p1875_p6 = por %p1874_p2, %p1873_p0 }
 0x161   : > { %p1871_p13 = pneg %p1870_p10 }
 0x163   : > { %p1876_p8 = pnand %p1875_p6, %p1871_p13 }
 0x165   : > { %1879 = shalt.err (!%p1876_p8)
}
 0x166   : > { %1591 = dma.vmem_to_hbm [thread:$0]  (%p2094_p11), %s3507_s16, 8192, %s1317_s9, %s1292_s7, %s1963_s12, %s1963_s12, %s1964_s8  }
 0x167   : > { %s1894_s0 = sshra.s32 %s1351_s26, 4  ;;  %s1900_s18 = scalar_lea.hbm %s3597_s6, 1024  ;;  %s1895_s0 = int_to_ptr.hbm [resolvable:$true] %s1894_s0 }
 0x168   : > { %s1896_s24 = scalar_lea.hbm %s1895_s0, 512  ;;  %p1901_p5 = scmp.lt.s32.totalorder %s1895_s0, %s3597_s6 }
 0x169   : > { %p1897_p4 = scmp.ne.s32.totalorder %s1895_s0, %s1896_s24  ;;  %p1902_p3 = scmp.lt.s32.totalorder %s1900_s18, %s1896_s24 }
 0x16b   : > { %p1898_p9 = pnand %p1897_p4, %p2094_p11  ;;  %p1903_p7 = por %p1902_p3, %p1901_p5 }
 0x16d   : > { %p1899_p1 = pneg %p1898_p9 }
 0x16f   : > { %p1904_p10 = pnand %p1903_p7, %p1899_p1 }
 0x171   : > { %1907 = shalt.err (!%p1904_p10)
}
 0x172   : > { %1593 = dma.vmem_to_hbm [thread:$0]  (%p2094_p11), %s3512_s10, 8192, %s1351_s26, %s3516_s2, %s1963_s12, %s1963_s12, %s1964_s8  }
 0x173 PF: > { %s3758_s16 = sld [smem:[#allocation19_spill]] }
 0x174   : > { %s3760_s27 = sld [smem:[#allocation20_spill]] }
 0x179   : > { %s1365_s7 = sand.u32 1, %s3758_s16  }
 0x17a   : > { %p3761_p13 = scmp.ge.s32.totalorder %s3760_s27, 2  ;;  %s1366_s11 = scalar_lea.sflag [#allocation4], %s1365_s7 }
 0x17c   : > { %p1612_p0 = pnand %p3761_p13, %p2098_p12 }
 0x17e   : > { %p1613_p2 = pneg %p1612_p0 }
 0x180   : > { %1937 = dma.done.wait (%p1613_p2), %s1366_s11, 8192  }
 0x181   : > { %1939 = vsyncadd (%p1613_p2), %s1366_s11, 4294959104  ;;  %s3762_s13 = sadd.s32 4294967294, %s3760_s27  }
 0x182   : > { %s1375_s14 = sand.u32 1, %s3762_s13  }
 0x183   : > { %s1376_s25 = scalar_lea.sflag [#allocation12], %s1375_s14 }
 0x184   : > { %1941 = dma.done.wait (%p1613_p2), %s1376_s25, 16384  }
 0x185   : > { %1943 = vsyncadd (%p1613_p2), %s1376_s25, 4294950912  ;;  %s3763_s24 = sld [smem:[#allocation21_spill]]  ;;  %s3765_s21 = smov %s1950_s22 }
 0x186   : > { %s3764_s26 = sld [smem:[#allocation22_spill]]  ;;  %s3766_s22 = smov %s1954_s23 }
 0x18b   : > { %p27_p11 = scmp.ge.s32.totalorder %s3763_s24, 4  }
 0x18c   : > { %s3767_s23 = smov %s3764_s26 }
 0x18d   :  { %29 = sbr.rel (!%p27_p11) target bundleno = 13 (0xd), region = 142 }
 0x192   :  { %1392 = vsyncpa [#allocation3], 1 }
 0x193   :  { %1394 = vsyncpa [#allocation3 + $0x1], 1 }
 0x194   :  { %1395 = vsyncpa [#allocation8], 1 }
 0x195   :  { %1397 = vsyncpa [#allocation8 + $0x1], 1 }
 0x196   :  { %1398 = vsyncpa [#allocation4], 1 }
 0x197   :  { %1400 = vsyncpa [#allocation4 + $0x1], 1 }
 0x198   :  { %1401 = vsyncpa [#allocation12], 1 }
 0x199   :  { %1403 = vsyncpa [#allocation12 + $0x1], 1 }
 0x19a   :  { %1404 = vsyncpa [#allocation5], 1 }
 0x19b   :  { %1406 = vsyncpa [#allocation5 + $0x1], 1 }

</bundles_post_ra>
